<compile_context>
chip_gen: v7x
topology: tpu7x:2x2x1
jax: 0.10.0
libtpu: 0.0.40
codegen_flags: <defaults>
</compile_context>

<pallas_src>
import functools

import jax
import jax.numpy as jnp
import numpy as np
from jax.experimental import pallas as pl
from jax.experimental.pallas import tpu as pltpu


def _round_up(x, m):
    return ((x + m - 1) // m) * m


def _pad_gate_cols(w, H, Hp):
    """(..., 4*H) -> (..., 4*Hp): gate block g is placed at columns [g*Hp, g*Hp+H)."""
    lead = w.shape[:-1]
    w4 = w.reshape(*lead, 4, H)
    pad = [(0, 0)] * (len(lead) + 1) + [(0, Hp - H)]
    return jnp.pad(w4, pad).reshape(*lead, 4 * Hp)


def _expand_bidir_rows(w, H, Hp):
    """(2, 2H, G) -> (2, 2Hp, G): fwd rows at [0:H], bwd rows at [Hp:Hp+H], rest 0."""
    G = w.shape[-1]
    out = jnp.zeros((w.shape[0], 2 * Hp, G), w.dtype)
    out = out.at[:, :H, :].set(w[:, :H, :])
    out = out.at[:, Hp:Hp + H, :].set(w[:, H:2 * H, :])
    return out


# ----------------------------------------------------------------------------
# Pallas kernel: both directions of one LSTM layer; one grid step = one
# direction x one chunk of TIME_CHUNK timesteps.  h/c carried in VMEM scratch.
# ----------------------------------------------------------------------------
def _bilstm_chunk_kernel(gx_ref, len_ref, whh_ref,
                         out_ref, h_out_ref, c_out_ref,
                         h_sc, c_sc, *, tc, hp, bp, unroll):
    d = pl.program_id(0)          # 0 = forward, 1 = backward   (parallel axis)
    c = pl.program_id(1)          # time-chunk index            (sequential axis)
    nc = pl.num_programs(1)

    @pl.when(c == 0)
    def _():
        h_sc[...] = jnp.zeros_like(h_sc)
        c_sc[...] = jnp.zeros_like(c_sc)

    whh = whh_ref[...]            # (Hp, 4Hp) bf16, hoisted out of the step loop
    # Per-sequence lengths broadcast once (hoisted) to the state shape.
    len_b = jnp.broadcast_to(len_ref[...], (bp, hp))        # (Bp, Hp) int32
    # Global time index of the first timestep of this chunk.
    chunk_t0 = (c + d * (nc - 1 - 2 * c)) * tc

    def step(i, carry):
        # Local position inside the chunk: fwd walks 0..tc-1, bwd walks tc-1..0.
        local = i + d * (tc - 1 - 2 * i)
        t_glob = chunk_t0 + local
        valid = t_glob < len_b                               # (Bp, Hp) bool

        gx = gx_ref[local].astype(jnp.float32)               # (Bp, 4Hp) from bf16
        h_prev = h_sc[...]
        c_prev = c_sc[...]

        gates = gx + jnp.dot(h_prev.astype(jnp.bfloat16), whh,
                             preferred_element_type=jnp.float32)   # (Bp, 4Hp) f32

        # Lane-tile aligned gate slices (hp is a multiple of 128).
        i_g = jax.nn.sigmoid(gates[:, 0 * hp:1 * hp])
        f_g = jax.nn.sigmoid(gates[:, 1 * hp:2 * hp])
        g_g = jnp.tanh(gates[:, 2 * hp:3 * hp])
        o_g = jax.nn.sigmoid(gates[:, 3 * hp:4 * hp])

        c_new = f_g * c_prev + i_g * g_g
        h_new = o_g * jnp.tanh(c_new)

        # Carry state only where the timestep is valid (packed-seq semantics):
        # single compare + selects instead of a 3-op float blend.
        c_nxt = jnp.where(valid, c_new, c_prev)
        h_nxt = jnp.where(valid, h_new, h_prev)
        h_sc[...] = h_nxt
        c_sc[...] = c_nxt

        # pad_packed_sequence zero-pads outputs past each sequence's length.
        out_ref[local] = jnp.where(valid, h_nxt,
                                   jnp.zeros_like(h_nxt)).astype(out_ref.dtype)
        return carry

    jax.lax.fori_loop(0, tc, step, 0, unroll=unroll)

    @pl.when(c == nc - 1)
    def _():
        h_out_ref[...] = h_sc[...]
        c_out_ref[...] = c_sc[...]


def _vmem_need_bytes(tc, Bp, Hp, out_bytes):
    gx_blk = tc * Bp * 4 * Hp * 2            # bf16 input-projection block
    out_blk = tc * Bp * Hp * out_bytes
    len_blk = Bp * 4
    whh = Hp * 4 * Hp * 2                    # bf16 recurrent weights
    state = Bp * Hp * 4                      # one f32 state block
    # double-buffered in/out blocks + weights + final-state blocks + scratch
    return 2 * (gx_blk + out_blk + len_blk + whh + 2 * state) + 2 * state


def _bilstm_pallas(gx, len2d, w_hh_p, *, Tp, Bp, Hp, tc, out_dtype):
    """Run both directions of one LSTM layer.

    gx:      (2, Tp, Bp, 4*Hp) bf16  precomputed input projection (+ bias)
    len2d:   (Bp, 1)           i32   per-sequence valid lengths
    w_hh_p:  (2, Hp, 4*Hp)     bf16  recurrent weights
    returns: out (Tp, Bp, 2*Hp) out_dtype  [fwd cols 0:Hp | bwd cols Hp:2Hp],
             h_fin (2, Bp, Hp) f32, c_fin (2, Bp, Hp) f32
    """
    nc = Tp // tc

    def t_chunk(d, c):
        # forward walks chunks 0..nc-1, backward walks nc-1..0
        return c + d * (nc - 1 - 2 * c)

    # Bound vreg live ranges for large batch tiles; full unroll for small ones.
    unroll = True if (Bp * 4 * Hp * 4) <= (64 << 10) else 4
    kernel = functools.partial(_bilstm_chunk_kernel, tc=tc, hp=Hp, bp=Bp,
                               unroll=unroll)

    out_bytes = jnp.dtype(out_dtype).itemsize
    vmem_need = _vmem_need_bytes(tc, Bp, Hp, out_bytes)
    vmem_limit = int(min(64 << 20, max((vmem_need * 3) // 2 + (1 << 20), 16 << 20)))

    out, h_fin, c_fin = pl.pallas_call(
        kernel,
        out_shape=(
            jax.ShapeDtypeStruct((Tp, Bp, 2 * Hp), out_dtype),
            jax.ShapeDtypeStruct((2, Bp, Hp), jnp.float32),
            jax.ShapeDtypeStruct((2, Bp, Hp), jnp.float32),
        ),
        grid_spec=pltpu.PrefetchScalarGridSpec(
            num_scalar_prefetch=0,
            grid=(2, nc),
            in_specs=[
                # Precomputed gates_x (bf16) for this direction / chunk.
                pl.BlockSpec((None, tc, Bp, 4 * Hp),
                             lambda d, c: (d, t_chunk(d, c), 0, 0)),
                # Per-sequence lengths (grid-invariant, tiny).
                pl.BlockSpec((Bp, 1), lambda d, c: (0, 0)),
                # Recurrent weights (grid-invariant along the chunk axis).
                pl.BlockSpec((None, Hp, 4 * Hp), lambda d, c: (d, 0, 0)),
            ],
            out_specs=[
                # fwd/bwd write disjoint 128-wide column blocks of the output.
                pl.BlockSpec((tc, Bp, Hp),
                             lambda d, c: (t_chunk(d, c), 0, d)),
                pl.BlockSpec((None, Bp, Hp), lambda d, c: (d, 0, 0)),
                pl.BlockSpec((None, Bp, Hp), lambda d, c: (d, 0, 0)),
            ],
            scratch_shapes=[
                pltpu.VMEM((Bp, Hp), jnp.float32),   # h carry
                pltpu.VMEM((Bp, Hp), jnp.float32),   # c carry
            ],
        ),
        # Direction axis is independent; time is the sequential recurrence.
        compiler_params=pltpu.CompilerParams(
            dimension_semantics=("parallel", "arbitrary"),
            vmem_limit_bytes=vmem_limit),
    )(gx, len2d, w_hh_p)
    return out, h_fin, c_fin


# ----------------------------------------------------------------------------
# Encoder: Embedding + bidirectional multi-layer LSTM (packed-sequence semantics)
# ----------------------------------------------------------------------------
def init_encoder_params(key, vocab_size, embedding_dim, hidden_dim, num_layers):
    params = {}
    key, sub = jax.random.split(key)
    params["embedding"] = jax.random.normal(
        sub, (vocab_size, embedding_dim), jnp.float32) * 0.1
    for layer in range(num_layers):
        in_dim = embedding_dim if layer == 0 else 2 * hidden_dim
        for direction in ("fwd", "bwd"):
            key, k1, k2, k3, k4 = jax.random.split(key, 5)
            # PyTorch stores (4H, in_dim) / (4H, H); we keep (in_dim, 4H) / (H, 4H).
            params[f"w_ih_l{layer}_{direction}"] = (
                jax.random.normal(k1, (in_dim, 4 * hidden_dim), jnp.float32) * 0.1)
            params[f"w_hh_l{layer}_{direction}"] = (
                jax.random.normal(k2, (hidden_dim, 4 * hidden_dim), jnp.float32) * 0.1)
            b_ih = jax.random.normal(k3, (4 * hidden_dim,), jnp.float32) * 0.1
            b_hh = jax.random.normal(k4, (4 * hidden_dim,), jnp.float32) * 0.1
            params[f"b_l{layer}_{direction}"] = b_ih + b_hh
    return params


def _pick_time_chunk(T, Bp, Hp):
    """Largest power-of-two chunk whose double-buffered streams fit ~8 MiB."""
    per_t = Bp * (4 * Hp) * 2 + Bp * Hp * 4     # gx (bf16) + out (<=f32) per step
    tc = 64
    while tc > 8 and 2 * tc * per_t > (8 << 20):
        tc //= 2
    return min(tc, max(8, _round_up(T, 8)))


def encoder_forward(params, x_ids, lengths, *, num_layers, hidden_dim,
                    time_chunk=None):
    B, T = x_ids.shape
    H = hidden_dim
    Hp = _round_up(H, 128)          # lane-dense hidden width
    Bp = _round_up(B, 8)            # sublane-dense batch
    tc = _pick_time_chunk(T, Bp, Hp) if time_chunk is None else time_chunk
    Tp = _round_up(T, tc)

    lengths = lengths.astype(jnp.int32)
    len2d = jnp.pad(lengths, (0, Bp - B)).reshape(Bp, 1)     # (Bp, 1) int32

    # Embedding gather (XLA glue), padded once to (Bp, Tp, E) in bf16 — padding
    # the narrow E-dim tensor instead of the wide 4Hp gates tensor.
    emb = params["embedding"][x_ids]                          # (B, T, E)
    emb_p = jnp.pad(emb, ((0, Bp - B), (0, Tp - T), (0, 0))).astype(jnp.bfloat16)

    hiddens, cells = [], []
    x_pad = None                                              # (Tp, Bp, 2*Hp) bf16, layers > 0

    for layer in range(num_layers):
        w_ih = jnp.stack([params[f"w_ih_l{layer}_fwd"],
                          params[f"w_ih_l{layer}_bwd"]])      # (2, Din, 4H)
        w_hh = jnp.stack([params[f"w_hh_l{layer}_fwd"],
                          params[f"w_hh_l{layer}_bwd"]])      # (2, H, 4H)
        bias = jnp.stack([params[f"b_l{layer}_fwd"],
                          params[f"b_l{layer}_bwd"]])         # (2, 4H)

        bias_p = _pad_gate_cols(bias, H, Hp)                  # (2, 4Hp) f32
        w_hh_p = _pad_gate_cols(
            jnp.pad(w_hh, ((0, 0), (0, Hp - H), (0, 0))), H, Hp
        ).astype(jnp.bfloat16)                                # (2, Hp, 4Hp) bf16

        # Hoisted input projection over ALL timesteps & both directions:
        # one large MXU-saturating bf16 matmul (f32 accumulation) outside the
        # serial recurrence, emitted directly in the padded layout.
        if layer == 0:
            w_ih_p = _pad_gate_cols(w_ih, H, Hp).astype(jnp.bfloat16)   # (2, E, 4Hp)
            gx = jnp.einsum("bte,zeg->ztbg", emb_p, w_ih_p,
                            preferred_element_type=jnp.float32)         # (2, Tp, Bp, 4Hp)
        else:
            w_ih_p = _pad_gate_cols(_expand_bidir_rows(w_ih, H, Hp),
                                    H, Hp).astype(jnp.bfloat16)         # (2, 2Hp, 4Hp)
            gx = jnp.einsum("tbd,zdg->ztbg", x_pad, w_ih_p,
                            preferred_element_type=jnp.float32)         # (2, Tp, Bp, 4Hp)
        gx = (gx + bias_p[:, None, None, :]).astype(jnp.bfloat16)       # bf16 HBM stream

        # Intermediate layers stay bf16 (feed the next layer's bf16 einsum);
        # the final layer emits f32 to match the module's output precision.
        out_dtype = jnp.float32 if layer == num_layers - 1 else jnp.bfloat16
        out_p, h_fin, c_fin = _bilstm_pallas(
            gx, len2d, w_hh_p, Tp=Tp, Bp=Bp, Hp=Hp, tc=tc, out_dtype=out_dtype)

        x_pad = out_p                                         # (Tp, Bp, 2Hp)
        hiddens += [h_fin[0, :B, :H], h_fin[1, :B, :H]]
        cells += [c_fin[0, :B, :H], c_fin[1, :B, :H]]

    # Final un-padding (done once, at the very end).
    outputs = jnp.concatenate(
        [x_pad[:T, :B, :H], x_pad[:T, :B, Hp:Hp + H]], axis=-1)   # (T, B, 2H)
    outputs = jnp.transpose(outputs, (1, 0, 2)).astype(jnp.float32)   # (B, T, 2H)
    hidden = jnp.stack(hiddens, axis=0)                           # (2*num_layers, B, H)
    cell = jnp.stack(cells, axis=0)
    return outputs, hidden, cell


# ----------------------------------------------------------------------------
# Pure-JAX reference (PyTorch pack_padded / pad_packed semantics) for checking.
# ----------------------------------------------------------------------------
def _reference_encoder(params, x_ids, lengths, *, num_layers, hidden_dim):
    emb = params["embedding"][x_ids]
    x = jnp.transpose(emb, (1, 0, 2))                   # (T, B, E)
    lengths = lengths.astype(jnp.int32)
    H = hidden_dim
    hiddens, cells = [], []
    for layer in range(num_layers):
        outs = []
        for direction, rev in (("fwd", False), ("bwd", True)):
            w_ih = params[f"w_ih_l{layer}_{direction}"]
            w_hh = params[f"w_hh_l{layer}_{direction}"]
            b = params[f"b_l{layer}_{direction}"]
            T, B = x.shape[0], x.shape[1]
            h = jnp.zeros((B, H), jnp.float32)
            c = jnp.zeros((B, H), jnp.float32)
            out_t = [None] * T
            t_order = range(T - 1, -1, -1) if rev else range(T)
            for t in t_order:
                gates = x[t] @ w_ih + h @ w_hh + b
                i_g = jax.nn.sigmoid(gates[:, :H])
                f_g = jax.nn.sigmoid(gates[:, H:2 * H])
                g_g = jnp.tanh(gates[:, 2 * H:3 * H])
                o_g = jax.nn.sigmoid(gates[:, 3 * H:4 * H])
                c_new = f_g * c + i_g * g_g
                h_new = o_g * jnp.tanh(c_new)
                m = (t < lengths)[:, None]
                c = jnp.where(m, c_new, c)
                h = jnp.where(m, h_new, h)
                out_t[t] = jnp.where(m, h, jnp.zeros_like(h))
            outs.append(jnp.stack(out_t, axis=0))
            hiddens.append(h)
            cells.append(c)
        x = jnp.concatenate(outs, axis=-1)
    outputs = jnp.transpose(x, (1, 0, 2))
    return outputs, jnp.stack(hiddens, 0), jnp.stack(cells, 0)


if __name__ == "__main__":
    vocab_size, embedding_dim, hidden_dim, num_layers = 50, 8, 16, 2
    B, T = 4, 8

    key = jax.random.PRNGKey(0)
    params = init_encoder_params(key, vocab_size, embedding_dim,
                                 hidden_dim, num_layers)

    key, k_ids = jax.random.split(key)
    x_ids = jax.random.randint(k_ids, (B, T), 0, vocab_size, dtype=jnp.int32)
    lengths_np = np.array([8, 5, 3, 6], dtype=np.int32)   # max == T
    lengths = jnp.asarray(lengths_np)

    outputs, hidden, cell = encoder_forward(
        params, x_ids, lengths, num_layers=num_layers, hidden_dim=hidden_dim)

    # pad_packed_sequence trims to max(lengths) (equal to T here).
    t_max = int(lengths_np.max())
    outputs = outputs[:, :t_max, :]
    jax.block_until_ready((outputs, hidden, cell))

    assert outputs.shape == (B, t_max, 2 * hidden_dim)
    assert hidden.shape == (num_layers * 2, B, hidden_dim)
    assert cell.shape == (num_layers * 2, B, hidden_dim)
    # Padded positions of outputs must be exactly zero.
    assert float(jnp.abs(outputs[1, 5:, :]).max()) == 0.0
    assert float(jnp.abs(outputs[2, 3:, :]).max()) == 0.0

    # Numerical check against a pure-JAX f32 reference (loose tolerance: the
    # input projection, recurrent weights and inter-layer activations use
    # bf16 with f32 accumulation).
    ref_out, ref_h, ref_c = _reference_encoder(
        params, x_ids, lengths, num_layers=num_layers, hidden_dim=hidden_dim)
    ref_out = ref_out[:, :t_max, :]
    np.testing.assert_allclose(np.asarray(outputs), np.asarray(ref_out),
                               rtol=3e-2, atol=3e-2)
    np.testing.assert_allclose(np.asarray(hidden), np.asarray(ref_h),
                               rtol=3e-2, atol=3e-2)
    np.testing.assert_allclose(np.asarray(cell), np.asarray(ref_c),
                               rtol=3e-2, atol=3e-2)

    print("KERNEL_OK")
</pallas_src>

<mosaic_0001>
module attributes {stable_mosaic.version = 11 : i64} {
  func.func @_bilstm_chunk_kernel(%arg0: i32, %arg1: i32, %arg2: memref<1x8x8x512xbf16, #tpu.memory_space<vmem>>, %arg3: memref<8x1xi32, #tpu.memory_space<vmem>>, %arg4: memref<1x128x512xbf16, #tpu.memory_space<vmem>>, %arg5: memref<8x8x128xbf16, #tpu.memory_space<vmem>>, %arg6: memref<1x8x128xf32, #tpu.memory_space<vmem>>, %arg7: memref<1x8x128xf32, #tpu.memory_space<vmem>>, %arg8: memref<8x128xf32, #tpu.memory_space<vmem>>, %arg9: memref<8x128xf32, #tpu.memory_space<vmem>>) attributes {dimension_semantics = [#tpu.dimension_semantics<parallel>, #tpu.dimension_semantics<arbitrary>], iteration_bounds = array<i64: 2, 1>, scalar_prefetch = 0 : i64, scratch_operands = 2 : i64, tpu.core_type = #tpu.core_type<tc>, window_params = [{transform_indices = @transform_0, window_bounds = array<i64: 1, 8, 8, 512>}, {pipeline_mode = #tpu.pipeline_mode<synchronous>, transform_indices = @transform_1, window_bounds = array<i64: 8, 1>}, {transform_indices = @transform_2, window_bounds = array<i64: 1, 128, 512>}, {transform_indices = @transform_3, window_bounds = array<i64: 8, 8, 128>}, {transform_indices = @transform_4, window_bounds = array<i64: 1, 8, 128>}, {transform_indices = @transform_5, window_bounds = array<i64: 1, 8, 128>}]} {
    %c0_i32 = arith.constant 0 : i32
    %0 = arith.cmpi eq, %arg1, %c0_i32 : i32
    %1 = arith.extui %0 : i1 to i32
    %c0_i32_0 = arith.constant 0 : i32
    %2 = arith.cmpi ne, %1, %c0_i32_0 : i32
    scf.if %2 {
      %cst_170 = arith.constant 0.000000e+00 : f32
      %432 = vector.broadcast %cst_170 : f32 to vector<8x128xf32>
      %c0_171 = arith.constant 0 : index
      %c0_172 = arith.constant 0 : index
      %433 = vector.load %arg8[%c0_171, %c0_172] : memref<8x128xf32, #tpu.memory_space<vmem>>, vector<8x128xf32>
      tpu.vector_store %arg8[%c0_171, %c0_172], %432 {strides = array<i32>} : memref<8x128xf32, #tpu.memory_space<vmem>>, vector<8x128xf32>,
      %cst_173 = arith.constant 0.000000e+00 : f32
      %434 = vector.broadcast %cst_173 : f32 to vector<8x128xf32>
      %c0_174 = arith.constant 0 : index
      %c0_175 = arith.constant 0 : index
      %435 = vector.load %arg9[%c0_174, %c0_175] : memref<8x128xf32, #tpu.memory_space<vmem>>, vector<8x128xf32>
      tpu.vector_store %arg9[%c0_174, %c0_175], %434 {strides = array<i32>} : memref<8x128xf32, #tpu.memory_space<vmem>>, vector<8x128xf32>,
    } else {
    }
    %c0 = arith.constant 0 : index
    %c0_1 = arith.constant 0 : index
    %c0_2 = arith.constant 0 : index
    %3 = vector.load %arg4[%c0, %c0_1, %c0_2] : memref<1x128x512xbf16, #tpu.memory_space<vmem>>, vector<1x128x512xbf16>
    %4 = vector.shape_cast %3 : vector<1x128x512xbf16> to vector<128x512xbf16>
    %c0_3 = arith.constant 0 : index
    %c0_4 = arith.constant 0 : index
    %5 = vector.load %arg3[%c0_3, %c0_4] : memref<8x1xi32, #tpu.memory_space<vmem>>, vector<8x1xi32>
    %6 = vector.shape_cast %5 : vector<8x1xi32> to vector<8x1xi32>
    %7 = vector.broadcast %6 : vector<8x1xi32> to vector<8x128xi32>
    %c2_i32 = arith.constant 2 : i32
    %8 = arith.muli %c2_i32, %arg1 : i32
    %c0_i32_5 = arith.constant 0 : i32
    %9 = arith.subi %c0_i32_5, %8 : i32
    %10 = arith.muli %arg0, %9 : i32
    %11 = arith.addi %arg1, %10 : i32
    %c8_i32 = arith.constant 8 : i32
    %12 = arith.muli %11, %c8_i32 : i32
    %c0_i32_6 = arith.constant 0 : i32
    %c2_i32_7 = arith.constant 2 : i32
    %13 = arith.muli %c2_i32_7, %c0_i32_6 : i32
    %c7_i32 = arith.constant 7 : i32
    %14 = arith.subi %c7_i32, %13 : i32
    %15 = arith.muli %arg0, %14 : i32
    %16 = arith.addi %c0_i32_6, %15 : i32
    %17 = arith.addi %12, %16 : i32
    %18 = vector.broadcast %17 : i32 to vector<8x128xi32>
    %19 = arith.cmpi slt, %18, %7 : vector<8x128xi32>
    %c0_8 = arith.constant 0 : index
    %20 = arith.index_cast %16 : i32 to index
    %c0_9 = arith.constant 0 : index
    %c0_10 = arith.constant 0 : index
    %21 = vector.load %arg2[%c0_8, %20, %c0_9, %c0_10] : memref<1x8x8x512xbf16, #tpu.memory_space<vmem>>, vector<1x1x8x512xbf16>
    %22 = vector.shape_cast %21 : vector<1x1x8x512xbf16> to vector<8x512xbf16>
    %23 = arith.extf %22 : vector<8x512xbf16> to vector<8x512xf32>
    %c0_11 = arith.constant 0 : index
    %c0_12 = arith.constant 0 : index
    %24 = vector.load %arg8[%c0_11, %c0_12] : memref<8x128xf32, #tpu.memory_space<vmem>>, vector<8x128xf32>
    %c0_13 = arith.constant 0 : index
    %c0_14 = arith.constant 0 : index
    %25 = vector.load %arg9[%c0_13, %c0_14] : memref<8x128xf32, #tpu.memory_space<vmem>>, vector<8x128xf32>
    %26 = arith.truncf %24 : vector<8x128xf32> to vector<8x128xbf16>
    %cst = arith.constant dense<0.000000e+00> : vector<8x512xf32>
    %27 = tpu.matmul %26, %4, %cst {dimension_numbers = #tpu.dot_dimension_numbers<[1], [0], [0], [1], [0, 0, 1, 1], [], []>} : vector<8x128xbf16>, vector<128x512xbf16>, vector<8x512xf32> -> vector<8x512xf32>
    %28 = arith.addf %23, %27 : vector<8x512xf32>
    %29 = vector.extract_strided_slice %28 {offsets = [0, 0], sizes = [8, 128], strides = [1, 1]} : vector<8x512xf32> to vector<8x128xf32>
    %30 = arith.negf %29 : vector<8x128xf32>
    %31 = math.exp %30 : vector<8x128xf32>
    %cst_15 = arith.constant 1.000000e+00 : f32
    %32 = vector.broadcast %cst_15 : f32 to vector<8x128xf32>
    %33 = arith.addf %32, %31 : vector<8x128xf32>
    %34 = arith.divf %32, %33 : vector<8x128xf32>
    %35 = vector.extract_strided_slice %28 {offsets = [0, 128], sizes = [8, 128], strides = [1, 1]} : vector<8x512xf32> to vector<8x128xf32>
    %36 = arith.negf %35 : vector<8x128xf32>
    %37 = math.exp %36 : vector<8x128xf32>
    %cst_16 = arith.constant 1.000000e+00 : f32
    %38 = vector.broadcast %cst_16 : f32 to vector<8x128xf32>
    %39 = arith.addf %38, %37 : vector<8x128xf32>
    %40 = arith.divf %38, %39 : vector<8x128xf32>
    %41 = vector.extract_strided_slice %28 {offsets = [0, 256], sizes = [8, 128], strides = [1, 1]} : vector<8x512xf32> to vector<8x128xf32>
    %42 = math.tanh %41 : vector<8x128xf32>
    %43 = vector.extract_strided_slice %28 {offsets = [0, 384], sizes = [8, 128], strides = [1, 1]} : vector<8x512xf32> to vector<8x128xf32>
    %44 = arith.negf %43 : vector<8x128xf32>
    %45 = math.exp %44 : vector<8x128xf32>
    %cst_17 = arith.constant 1.000000e+00 : f32
    %46 = vector.broadcast %cst_17 : f32 to vector<8x128xf32>
    %47 = arith.addf %46, %45 : vector<8x128xf32>
    %48 = arith.divf %46, %47 : vector<8x128xf32>
    %49 = arith.mulf %40, %25 : vector<8x128xf32>
    %50 = arith.mulf %34, %42 : vector<8x128xf32>
    %51 = arith.addf %49, %50 : vector<8x128xf32>
    %52 = math.tanh %51 : vector<8x128xf32>
    %53 = arith.mulf %48, %52 : vector<8x128xf32>
    %54 = arith.select %19, %51, %25 : vector<8x128xi1>, vector<8x128xf32>
    %55 = arith.select %19, %53, %24 : vector<8x128xi1>, vector<8x128xf32>
    %c0_18 = arith.constant 0 : index
    %c0_19 = arith.constant 0 : index
    %56 = vector.load %arg8[%c0_18, %c0_19] : memref<8x128xf32, #tpu.memory_space<vmem>>, vector<8x128xf32>
    tpu.vector_store %arg8[%c0_18, %c0_19], %55 {strides = array<i32>} : memref<8x128xf32, #tpu.memory_space<vmem>>, vector<8x128xf32>,
    %c0_20 = arith.constant 0 : index
    %c0_21 = arith.constant 0 : index
    %57 = vector.load %arg9[%c0_20, %c0_21] : memref<8x128xf32, #tpu.memory_space<vmem>>, vector<8x128xf32>
    tpu.vector_store %arg9[%c0_20, %c0_21], %54 {strides = array<i32>} : memref<8x128xf32, #tpu.memory_space<vmem>>, vector<8x128xf32>,
    %cst_22 = arith.constant 0.000000e+00 : f32
    %58 = vector.broadcast %cst_22 : f32 to vector<8x128xf32>
    %59 = arith.select %19, %55, %58 : vector<8x128xi1>, vector<8x128xf32>
    %60 = arith.truncf %59 : vector<8x128xf32> to vector<8x128xbf16>
    %61 = arith.index_cast %16 : i32 to index
    %c0_23 = arith.constant 0 : index
    %c0_24 = arith.constant 0 : index
    %62 = vector.load %arg5[%61, %c0_23, %c0_24] : memref<8x8x128xbf16, #tpu.memory_space<vmem>>, vector<1x8x128xbf16>
    %63 = vector.shape_cast %62 : vector<1x8x128xbf16> to vector<8x128xbf16>
    %64 = vector.shape_cast %60 : vector<8x128xbf16> to vector<1x8x128xbf16>
    tpu.vector_store %arg5[%61, %c0_23, %c0_24], %64 {strides = array<i32>} : memref<8x8x128xbf16, #tpu.memory_space<vmem>>, vector<1x8x128xbf16>,
    %c1_i32 = arith.constant 1 : i32
    %c2_i32_25 = arith.constant 2 : i32
    %65 = arith.muli %c2_i32_25, %c1_i32 : i32
    %c7_i32_26 = arith.constant 7 : i32
    %66 = arith.subi %c7_i32_26, %65 : i32
    %67 = arith.muli %arg0, %66 : i32
    %68 = arith.addi %c1_i32, %67 : i32
    %69 = arith.addi %12, %68 : i32
    %70 = vector.broadcast %69 : i32 to vector<8x128xi32>
    %71 = arith.cmpi slt, %70, %7 : vector<8x128xi32>
    %c0_27 = arith.constant 0 : index
    %72 = arith.index_cast %68 : i32 to index
    %c0_28 = arith.constant 0 : index
    %c0_29 = arith.constant 0 : index
    %73 = vector.load %arg2[%c0_27, %72, %c0_28, %c0_29] : memref<1x8x8x512xbf16, #tpu.memory_space<vmem>>, vector<1x1x8x512xbf16>
    %74 = vector.shape_cast %73 : vector<1x1x8x512xbf16> to vector<8x512xbf16>
    %75 = arith.extf %74 : vector<8x512xbf16> to vector<8x512xf32>
    %c0_30 = arith.constant 0 : index
    %c0_31 = arith.constant 0 : index
    %76 = vector.load %arg8[%c0_30, %c0_31] : memref<8x128xf32, #tpu.memory_space<vmem>>, vector<8x128xf32>
    %c0_32 = arith.constant 0 : index
    %c0_33 = arith.constant 0 : index
    %77 = vector.load %arg9[%c0_32, %c0_33] : memref<8x128xf32, #tpu.memory_space<vmem>>, vector<8x128xf32>
    %78 = arith.truncf %76 : vector<8x128xf32> to vector<8x128xbf16>
    %cst_34 = arith.constant dense<0.000000e+00> : vector<8x512xf32>
    %79 = tpu.matmul %78, %4, %cst_34 {dimension_numbers = #tpu.dot_dimension_numbers<[1], [0], [0], [1], [0, 0, 1, 1], [], []>} : vector<8x128xbf16>, vector<128x512xbf16>, vector<8x512xf32> -> vector<8x512xf32>
    %80 = arith.addf %75, %79 : vector<8x512xf32>
    %81 = vector.extract_strided_slice %80 {offsets = [0, 0], sizes = [8, 128], strides = [1, 1]} : vector<8x512xf32> to vector<8x128xf32>
    %82 = arith.negf %81 : vector<8x128xf32>
    %83 = math.exp %82 : vector<8x128xf32>
    %cst_35 = arith.constant 1.000000e+00 : f32
    %84 = vector.broadcast %cst_35 : f32 to vector<8x128xf32>
    %85 = arith.addf %84, %83 : vector<8x128xf32>
    %86 = arith.divf %84, %85 : vector<8x128xf32>
    %87 = vector.extract_strided_slice %80 {offsets = [0, 128], sizes = [8, 128], strides = [1, 1]} : vector<8x512xf32> to vector<8x128xf32>
    %88 = arith.negf %87 : vector<8x128xf32>
    %89 = math.exp %88 : vector<8x128xf32>
    %cst_36 = arith.constant 1.000000e+00 : f32
    %90 = vector.broadcast %cst_36 : f32 to vector<8x128xf32>
    %91 = arith.addf %90, %89 : vector<8x128xf32>
    %92 = arith.divf %90, %91 : vector<8x128xf32>
    %93 = vector.extract_strided_slice %80 {offsets = [0, 256], sizes = [8, 128], strides = [1, 1]} : vector<8x512xf32> to vector<8x128xf32>
    %94 = math.tanh %93 : vector<8x128xf32>
    %95 = vector.extract_strided_slice %80 {offsets = [0, 384], sizes = [8, 128], strides = [1, 1]} : vector<8x512xf32> to vector<8x128xf32>
    %96 = arith.negf %95 : vector<8x128xf32>
    %97 = math.exp %96 : vector<8x128xf32>
    %cst_37 = arith.constant 1.000000e+00 : f32
    %98 = vector.broadcast %cst_37 : f32 to vector<8x128xf32>
    %99 = arith.addf %98, %97 : vector<8x128xf32>
    %100 = arith.divf %98, %99 : vector<8x128xf32>
    %101 = arith.mulf %92, %77 : vector<8x128xf32>
    %102 = arith.mulf %86, %94 : vector<8x128xf32>
    %103 = arith.addf %101, %102 : vector<8x128xf32>
    %104 = math.tanh %103 : vector<8x128xf32>
    %105 = arith.mulf %100, %104 : vector<8x128xf32>
    %106 = arith.select %71, %103, %77 : vector<8x128xi1>, vector<8x128xf32>
    %107 = arith.select %71, %105, %76 : vector<8x128xi1>, vector<8x128xf32>
    %c0_38 = arith.constant 0 : index
    %c0_39 = arith.constant 0 : index
    %108 = vector.load %arg8[%c0_38, %c0_39] : memref<8x128xf32, #tpu.memory_space<vmem>>, vector<8x128xf32>
    tpu.vector_store %arg8[%c0_38, %c0_39], %107 {strides = array<i32>} : memref<8x128xf32, #tpu.memory_space<vmem>>, vector<8x128xf32>,
    %c0_40 = arith.constant 0 : index
    %c0_41 = arith.constant 0 : index
    %109 = vector.load %arg9[%c0_40, %c0_41] : memref<8x128xf32, #tpu.memory_space<vmem>>, vector<8x128xf32>
    tpu.vector_store %arg9[%c0_40, %c0_41], %106 {strides = array<i32>} : memref<8x128xf32, #tpu.memory_space<vmem>>, vector<8x128xf32>,
    %cst_42 = arith.constant 0.000000e+00 : f32
    %110 = vector.broadcast %cst_42 : f32 to vector<8x128xf32>
    %111 = arith.select %71, %107, %110 : vector<8x128xi1>, vector<8x128xf32>
    %112 = arith.truncf %111 : vector<8x128xf32> to vector<8x128xbf16>
    %113 = arith.index_cast %68 : i32 to index
    %c0_43 = arith.constant 0 : index
    %c0_44 = arith.constant 0 : index
    %114 = vector.load %arg5[%113, %c0_43, %c0_44] : memref<8x8x128xbf16, #tpu.memory_space<vmem>>, vector<1x8x128xbf16>
    %115 = vector.shape_cast %114 : vector<1x8x128xbf16> to vector<8x128xbf16>
    %116 = vector.shape_cast %112 : vector<8x128xbf16> to vector<1x8x128xbf16>
    tpu.vector_store %arg5[%113, %c0_43, %c0_44], %116 {strides = array<i32>} : memref<8x8x128xbf16, #tpu.memory_space<vmem>>, vector<1x8x128xbf16>,
    %c2_i32_45 = arith.constant 2 : i32
    %c2_i32_46 = arith.constant 2 : i32
    %117 = arith.muli %c2_i32_46, %c2_i32_45 : i32
    %c7_i32_47 = arith.constant 7 : i32
    %118 = arith.subi %c7_i32_47, %117 : i32
    %119 = arith.muli %arg0, %118 : i32
    %120 = arith.addi %c2_i32_45, %119 : i32
    %121 = arith.addi %12, %120 : i32
    %122 = vector.broadcast %121 : i32 to vector<8x128xi32>
    %123 = arith.cmpi slt, %122, %7 : vector<8x128xi32>
    %c0_48 = arith.constant 0 : index
    %124 = arith.index_cast %120 : i32 to index
    %c0_49 = arith.constant 0 : index
    %c0_50 = arith.constant 0 : index
    %125 = vector.load %arg2[%c0_48, %124, %c0_49, %c0_50] : memref<1x8x8x512xbf16, #tpu.memory_space<vmem>>, vector<1x1x8x512xbf16>
    %126 = vector.shape_cast %125 : vector<1x1x8x512xbf16> to vector<8x512xbf16>
    %127 = arith.extf %126 : vector<8x512xbf16> to vector<8x512xf32>
    %c0_51 = arith.constant 0 : index
    %c0_52 = arith.constant 0 : index
    %128 = vector.load %arg8[%c0_51, %c0_52] : memref<8x128xf32, #tpu.memory_space<vmem>>, vector<8x128xf32>
    %c0_53 = arith.constant 0 : index
    %c0_54 = arith.constant 0 : index
    %129 = vector.load %arg9[%c0_53, %c0_54] : memref<8x128xf32, #tpu.memory_space<vmem>>, vector<8x128xf32>
    %130 = arith.truncf %128 : vector<8x128xf32> to vector<8x128xbf16>
    %cst_55 = arith.constant dense<0.000000e+00> : vector<8x512xf32>
    %131 = tpu.matmul %130, %4, %cst_55 {dimension_numbers = #tpu.dot_dimension_numbers<[1], [0], [0], [1], [0, 0, 1, 1], [], []>} : vector<8x128xbf16>, vector<128x512xbf16>, vector<8x512xf32> -> vector<8x512xf32>
    %132 = arith.addf %127, %131 : vector<8x512xf32>
    %133 = vector.extract_strided_slice %132 {offsets = [0, 0], sizes = [8, 128], strides = [1, 1]} : vector<8x512xf32> to vector<8x128xf32>
    %134 = arith.negf %133 : vector<8x128xf32>
    %135 = math.exp %134 : vector<8x128xf32>
    %cst_56 = arith.constant 1.000000e+00 : f32
    %136 = vector.broadcast %cst_56 : f32 to vector<8x128xf32>
    %137 = arith.addf %136, %135 : vector<8x128xf32>
    %138 = arith.divf %136, %137 : vector<8x128xf32>
    %139 = vector.extract_strided_slice %132 {offsets = [0, 128], sizes = [8, 128], strides = [1, 1]} : vector<8x512xf32> to vector<8x128xf32>
    %140 = arith.negf %139 : vector<8x128xf32>
    %141 = math.exp %140 : vector<8x128xf32>
    %cst_57 = arith.constant 1.000000e+00 : f32
    %142 = vector.broadcast %cst_57 : f32 to vector<8x128xf32>
    %143 = arith.addf %142, %141 : vector<8x128xf32>
    %144 = arith.divf %142, %143 : vector<8x128xf32>
    %145 = vector.extract_strided_slice %132 {offsets = [0, 256], sizes = [8, 128], strides = [1, 1]} : vector<8x512xf32> to vector<8x128xf32>
    %146 = math.tanh %145 : vector<8x128xf32>
    %147 = vector.extract_strided_slice %132 {offsets = [0, 384], sizes = [8, 128], strides = [1, 1]} : vector<8x512xf32> to vector<8x128xf32>
    %148 = arith.negf %147 : vector<8x128xf32>
    %149 = math.exp %148 : vector<8x128xf32>
    %cst_58 = arith.constant 1.000000e+00 : f32
    %150 = vector.broadcast %cst_58 : f32 to vector<8x128xf32>
    %151 = arith.addf %150, %149 : vector<8x128xf32>
    %152 = arith.divf %150, %151 : vector<8x128xf32>
    %153 = arith.mulf %144, %129 : vector<8x128xf32>
    %154 = arith.mulf %138, %146 : vector<8x128xf32>
    %155 = arith.addf %153, %154 : vector<8x128xf32>
    %156 = math.tanh %155 : vector<8x128xf32>
    %157 = arith.mulf %152, %156 : vector<8x128xf32>
    %158 = arith.select %123, %155, %129 : vector<8x128xi1>, vector<8x128xf32>
    %159 = arith.select %123, %157, %128 : vector<8x128xi1>, vector<8x128xf32>
    %c0_59 = arith.constant 0 : index
    %c0_60 = arith.constant 0 : index
    %160 = vector.load %arg8[%c0_59, %c0_60] : memref<8x128xf32, #tpu.memory_space<vmem>>, vector<8x128xf32>
    tpu.vector_store %arg8[%c0_59, %c0_60], %159 {strides = array<i32>} : memref<8x128xf32, #tpu.memory_space<vmem>>, vector<8x128xf32>,
    %c0_61 = arith.constant 0 : index
    %c0_62 = arith.constant 0 : index
    %161 = vector.load %arg9[%c0_61, %c0_62] : memref<8x128xf32, #tpu.memory_space<vmem>>, vector<8x128xf32>
    tpu.vector_store %arg9[%c0_61, %c0_62], %158 {strides = array<i32>} : memref<8x128xf32, #tpu.memory_space<vmem>>, vector<8x128xf32>,
    %cst_63 = arith.constant 0.000000e+00 : f32
    %162 = vector.broadcast %cst_63 : f32 to vector<8x128xf32>
    %163 = arith.select %123, %159, %162 : vector<8x128xi1>, vector<8x128xf32>
    %164 = arith.truncf %163 : vector<8x128xf32> to vector<8x128xbf16>
    %165 = arith.index_cast %120 : i32 to index
    %c0_64 = arith.constant 0 : index
    %c0_65 = arith.constant 0 : index
    %166 = vector.load %arg5[%165, %c0_64, %c0_65] : memref<8x8x128xbf16, #tpu.memory_space<vmem>>, vector<1x8x128xbf16>
    %167 = vector.shape_cast %166 : vector<1x8x128xbf16> to vector<8x128xbf16>
    %168 = vector.shape_cast %164 : vector<8x128xbf16> to vector<1x8x128xbf16>
    tpu.vector_store %arg5[%165, %c0_64, %c0_65], %168 {strides = array<i32>} : memref<8x8x128xbf16, #tpu.memory_space<vmem>>, vector<1x8x128xbf16>,
    %c3_i32 = arith.constant 3 : i32
    %c2_i32_66 = arith.constant 2 : i32
    %169 = arith.muli %c2_i32_66, %c3_i32 : i32
    %c7_i32_67 = arith.constant 7 : i32
    %170 = arith.subi %c7_i32_67, %169 : i32
    %171 = arith.muli %arg0, %170 : i32
    %172 = arith.addi %c3_i32, %171 : i32
    %173 = arith.addi %12, %172 : i32
    %174 = vector.broadcast %173 : i32 to vector<8x128xi32>
    %175 = arith.cmpi slt, %174, %7 : vector<8x128xi32>
    %c0_68 = arith.constant 0 : index
    %176 = arith.index_cast %172 : i32 to index
    %c0_69 = arith.constant 0 : index
    %c0_70 = arith.constant 0 : index
    %177 = vector.load %arg2[%c0_68, %176, %c0_69, %c0_70] : memref<1x8x8x512xbf16, #tpu.memory_space<vmem>>, vector<1x1x8x512xbf16>
    %178 = vector.shape_cast %177 : vector<1x1x8x512xbf16> to vector<8x512xbf16>
    %179 = arith.extf %178 : vector<8x512xbf16> to vector<8x512xf32>
    %c0_71 = arith.constant 0 : index
    %c0_72 = arith.constant 0 : index
    %180 = vector.load %arg8[%c0_71, %c0_72] : memref<8x128xf32, #tpu.memory_space<vmem>>, vector<8x128xf32>
    %c0_73 = arith.constant 0 : index
    %c0_74 = arith.constant 0 : index
    %181 = vector.load %arg9[%c0_73, %c0_74] : memref<8x128xf32, #tpu.memory_space<vmem>>, vector<8x128xf32>
    %182 = arith.truncf %180 : vector<8x128xf32> to vector<8x128xbf16>
    %cst_75 = arith.constant dense<0.000000e+00> : vector<8x512xf32>
    %183 = tpu.matmul %182, %4, %cst_75 {dimension_numbers = #tpu.dot_dimension_numbers<[1], [0], [0], [1], [0, 0, 1, 1], [], []>} : vector<8x128xbf16>, vector<128x512xbf16>, vector<8x512xf32> -> vector<8x512xf32>
    %184 = arith.addf %179, %183 : vector<8x512xf32>
    %185 = vector.extract_strided_slice %184 {offsets = [0, 0], sizes = [8, 128], strides = [1, 1]} : vector<8x512xf32> to vector<8x128xf32>
    %186 = arith.negf %185 : vector<8x128xf32>
    %187 = math.exp %186 : vector<8x128xf32>
    %cst_76 = arith.constant 1.000000e+00 : f32
    %188 = vector.broadcast %cst_76 : f32 to vector<8x128xf32>
    %189 = arith.addf %188, %187 : vector<8x128xf32>
    %190 = arith.divf %188, %189 : vector<8x128xf32>
    %191 = vector.extract_strided_slice %184 {offsets = [0, 128], sizes = [8, 128], strides = [1, 1]} : vector<8x512xf32> to vector<8x128xf32>
    %192 = arith.negf %191 : vector<8x128xf32>
    %193 = math.exp %192 : vector<8x128xf32>
    %cst_77 = arith.constant 1.000000e+00 : f32
    %194 = vector.broadcast %cst_77 : f32 to vector<8x128xf32>
    %195 = arith.addf %194, %193 : vector<8x128xf32>
    %196 = arith.divf %194, %195 : vector<8x128xf32>
    %197 = vector.extract_strided_slice %184 {offsets = [0, 256], sizes = [8, 128], strides = [1, 1]} : vector<8x512xf32> to vector<8x128xf32>
    %198 = math.tanh %197 : vector<8x128xf32>
    %199 = vector.extract_strided_slice %184 {offsets = [0, 384], sizes = [8, 128], strides = [1, 1]} : vector<8x512xf32> to vector<8x128xf32>
    %200 = arith.negf %199 : vector<8x128xf32>
    %201 = math.exp %200 : vector<8x128xf32>
    %cst_78 = arith.constant 1.000000e+00 : f32
    %202 = vector.broadcast %cst_78 : f32 to vector<8x128xf32>
    %203 = arith.addf %202, %201 : vector<8x128xf32>
    %204 = arith.divf %202, %203 : vector<8x128xf32>
    %205 = arith.mulf %196, %181 : vector<8x128xf32>
    %206 = arith.mulf %190, %198 : vector<8x128xf32>
    %207 = arith.addf %205, %206 : vector<8x128xf32>
    %208 = math.tanh %207 : vector<8x128xf32>
    %209 = arith.mulf %204, %208 : vector<8x128xf32>
    %210 = arith.select %175, %207, %181 : vector<8x128xi1>, vector<8x128xf32>
    %211 = arith.select %175, %209, %180 : vector<8x128xi1>, vector<8x128xf32>
    %c0_79 = arith.constant 0 : index
    %c0_80 = arith.constant 0 : index
    %212 = vector.load %arg8[%c0_79, %c0_80] : memref<8x128xf32, #tpu.memory_space<vmem>>, vector<8x128xf32>
    tpu.vector_store %arg8[%c0_79, %c0_80], %211 {strides = array<i32>} : memref<8x128xf32, #tpu.memory_space<vmem>>, vector<8x128xf32>,
    %c0_81 = arith.constant 0 : index
    %c0_82 = arith.constant 0 : index
    %213 = vector.load %arg9[%c0_81, %c0_82] : memref<8x128xf32, #tpu.memory_space<vmem>>, vector<8x128xf32>
    tpu.vector_store %arg9[%c0_81, %c0_82], %210 {strides = array<i32>} : memref<8x128xf32, #tpu.memory_space<vmem>>, vector<8x128xf32>,
    %cst_83 = arith.constant 0.000000e+00 : f32
    %214 = vector.broadcast %cst_83 : f32 to vector<8x128xf32>
    %215 = arith.select %175, %211, %214 : vector<8x128xi1>, vector<8x128xf32>
    %216 = arith.truncf %215 : vector<8x128xf32> to vector<8x128xbf16>
    %217 = arith.index_cast %172 : i32 to index
    %c0_84 = arith.constant 0 : index
    %c0_85 = arith.constant 0 : index
    %218 = vector.load %arg5[%217, %c0_84, %c0_85] : memref<8x8x128xbf16, #tpu.memory_space<vmem>>, vector<1x8x128xbf16>
    %219 = vector.shape_cast %218 : vector<1x8x128xbf16> to vector<8x128xbf16>
    %220 = vector.shape_cast %216 : vector<8x128xbf16> to vector<1x8x128xbf16>
    tpu.vector_store %arg5[%217, %c0_84, %c0_85], %220 {strides = array<i32>} : memref<8x8x128xbf16, #tpu.memory_space<vmem>>, vector<1x8x128xbf16>,
    %c4_i32 = arith.constant 4 : i32
    %c2_i32_86 = arith.constant 2 : i32
    %221 = arith.muli %c2_i32_86, %c4_i32 : i32
    %c7_i32_87 = arith.constant 7 : i32
    %222 = arith.subi %c7_i32_87, %221 : i32
    %223 = arith.muli %arg0, %222 : i32
    %224 = arith.addi %c4_i32, %223 : i32
    %225 = arith.addi %12, %224 : i32
    %226 = vector.broadcast %225 : i32 to vector<8x128xi32>
    %227 = arith.cmpi slt, %226, %7 : vector<8x128xi32>
    %c0_88 = arith.constant 0 : index
    %228 = arith.index_cast %224 : i32 to index
    %c0_89 = arith.constant 0 : index
    %c0_90 = arith.constant 0 : index
    %229 = vector.load %arg2[%c0_88, %228, %c0_89, %c0_90] : memref<1x8x8x512xbf16, #tpu.memory_space<vmem>>, vector<1x1x8x512xbf16>
    %230 = vector.shape_cast %229 : vector<1x1x8x512xbf16> to vector<8x512xbf16>
    %231 = arith.extf %230 : vector<8x512xbf16> to vector<8x512xf32>
    %c0_91 = arith.constant 0 : index
    %c0_92 = arith.constant 0 : index
    %232 = vector.load %arg8[%c0_91, %c0_92] : memref<8x128xf32, #tpu.memory_space<vmem>>, vector<8x128xf32>
    %c0_93 = arith.constant 0 : index
    %c0_94 = arith.constant 0 : index
    %233 = vector.load %arg9[%c0_93, %c0_94] : memref<8x128xf32, #tpu.memory_space<vmem>>, vector<8x128xf32>
    %234 = arith.truncf %232 : vector<8x128xf32> to vector<8x128xbf16>
    %cst_95 = arith.constant dense<0.000000e+00> : vector<8x512xf32>
    %235 = tpu.matmul %234, %4, %cst_95 {dimension_numbers = #tpu.dot_dimension_numbers<[1], [0], [0], [1], [0, 0, 1, 1], [], []>} : vector<8x128xbf16>, vector<128x512xbf16>, vector<8x512xf32> -> vector<8x512xf32>
    %236 = arith.addf %231, %235 : vector<8x512xf32>
    %237 = vector.extract_strided_slice %236 {offsets = [0, 0], sizes = [8, 128], strides = [1, 1]} : vector<8x512xf32> to vector<8x128xf32>
    %238 = arith.negf %237 : vector<8x128xf32>
    %239 = math.exp %238 : vector<8x128xf32>
    %cst_96 = arith.constant 1.000000e+00 : f32
    %240 = vector.broadcast %cst_96 : f32 to vector<8x128xf32>
    %241 = arith.addf %240, %239 : vector<8x128xf32>
    %242 = arith.divf %240, %241 : vector<8x128xf32>
    %243 = vector.extract_strided_slice %236 {offsets = [0, 128], sizes = [8, 128], strides = [1, 1]} : vector<8x512xf32> to vector<8x128xf32>
    %244 = arith.negf %243 : vector<8x128xf32>
    %245 = math.exp %244 : vector<8x128xf32>
    %cst_97 = arith.constant 1.000000e+00 : f32
    %246 = vector.broadcast %cst_97 : f32 to vector<8x128xf32>
    %247 = arith.addf %246, %245 : vector<8x128xf32>
    %248 = arith.divf %246, %247 : vector<8x128xf32>
    %249 = vector.extract_strided_slice %236 {offsets = [0, 256], sizes = [8, 128], strides = [1, 1]} : vector<8x512xf32> to vector<8x128xf32>
    %250 = math.tanh %249 : vector<8x128xf32>
    %251 = vector.extract_strided_slice %236 {offsets = [0, 384], sizes = [8, 128], strides = [1, 1]} : vector<8x512xf32> to vector<8x128xf32>
    %252 = arith.negf %251 : vector<8x128xf32>
    %253 = math.exp %252 : vector<8x128xf32>
    %cst_98 = arith.constant 1.000000e+00 : f32
    %254 = vector.broadcast %cst_98 : f32 to vector<8x128xf32>
    %255 = arith.addf %254, %253 : vector<8x128xf32>
    %256 = arith.divf %254, %255 : vector<8x128xf32>
    %257 = arith.mulf %248, %233 : vector<8x128xf32>
    %258 = arith.mulf %242, %250 : vector<8x128xf32>
    %259 = arith.addf %257, %258 : vector<8x128xf32>
    %260 = math.tanh %259 : vector<8x128xf32>
    %261 = arith.mulf %256, %260 : vector<8x128xf32>
    %262 = arith.select %227, %259, %233 : vector<8x128xi1>, vector<8x128xf32>
    %263 = arith.select %227, %261, %232 : vector<8x128xi1>, vector<8x128xf32>
    %c0_99 = arith.constant 0 : index
    %c0_100 = arith.constant 0 : index
    %264 = vector.load %arg8[%c0_99, %c0_100] : memref<8x128xf32, #tpu.memory_space<vmem>>, vector<8x128xf32>
    tpu.vector_store %arg8[%c0_99, %c0_100], %263 {strides = array<i32>} : memref<8x128xf32, #tpu.memory_space<vmem>>, vector<8x128xf32>,
    %c0_101 = arith.constant 0 : index
    %c0_102 = arith.constant 0 : index
    %265 = vector.load %arg9[%c0_101, %c0_102] : memref<8x128xf32, #tpu.memory_space<vmem>>, vector<8x128xf32>
    tpu.vector_store %arg9[%c0_101, %c0_102], %262 {strides = array<i32>} : memref<8x128xf32, #tpu.memory_space<vmem>>, vector<8x128xf32>,
    %cst_103 = arith.constant 0.000000e+00 : f32
    %266 = vector.broadcast %cst_103 : f32 to vector<8x128xf32>
    %267 = arith.select %227, %263, %266 : vector<8x128xi1>, vector<8x128xf32>
    %268 = arith.truncf %267 : vector<8x128xf32> to vector<8x128xbf16>
    %269 = arith.index_cast %224 : i32 to index
    %c0_104 = arith.constant 0 : index
    %c0_105 = arith.constant 0 : index
    %270 = vector.load %arg5[%269, %c0_104, %c0_105] : memref<8x8x128xbf16, #tpu.memory_space<vmem>>, vector<1x8x128xbf16>
    %271 = vector.shape_cast %270 : vector<1x8x128xbf16> to vector<8x128xbf16>
    %272 = vector.shape_cast %268 : vector<8x128xbf16> to vector<1x8x128xbf16>
    tpu.vector_store %arg5[%269, %c0_104, %c0_105], %272 {strides = array<i32>} : memref<8x8x128xbf16, #tpu.memory_space<vmem>>, vector<1x8x128xbf16>,
    %c5_i32 = arith.constant 5 : i32
    %c2_i32_106 = arith.constant 2 : i32
    %273 = arith.muli %c2_i32_106, %c5_i32 : i32
    %c7_i32_107 = arith.constant 7 : i32
    %274 = arith.subi %c7_i32_107, %273 : i32
    %275 = arith.muli %arg0, %274 : i32
    %276 = arith.addi %c5_i32, %275 : i32
    %277 = arith.addi %12, %276 : i32
    %278 = vector.broadcast %277 : i32 to vector<8x128xi32>
    %279 = arith.cmpi slt, %278, %7 : vector<8x128xi32>
    %c0_108 = arith.constant 0 : index
    %280 = arith.index_cast %276 : i32 to index
    %c0_109 = arith.constant 0 : index
    %c0_110 = arith.constant 0 : index
    %281 = vector.load %arg2[%c0_108, %280, %c0_109, %c0_110] : memref<1x8x8x512xbf16, #tpu.memory_space<vmem>>, vector<1x1x8x512xbf16>
    %282 = vector.shape_cast %281 : vector<1x1x8x512xbf16> to vector<8x512xbf16>
    %283 = arith.extf %282 : vector<8x512xbf16> to vector<8x512xf32>
    %c0_111 = arith.constant 0 : index
    %c0_112 = arith.constant 0 : index
    %284 = vector.load %arg8[%c0_111, %c0_112] : memref<8x128xf32, #tpu.memory_space<vmem>>, vector<8x128xf32>
    %c0_113 = arith.constant 0 : index
    %c0_114 = arith.constant 0 : index
    %285 = vector.load %arg9[%c0_113, %c0_114] : memref<8x128xf32, #tpu.memory_space<vmem>>, vector<8x128xf32>
    %286 = arith.truncf %284 : vector<8x128xf32> to vector<8x128xbf16>
    %cst_115 = arith.constant dense<0.000000e+00> : vector<8x512xf32>
    %287 = tpu.matmul %286, %4, %cst_115 {dimension_numbers = #tpu.dot_dimension_numbers<[1], [0], [0], [1], [0, 0, 1, 1], [], []>} : vector<8x128xbf16>, vector<128x512xbf16>, vector<8x512xf32> -> vector<8x512xf32>
    %288 = arith.addf %283, %287 : vector<8x512xf32>
    %289 = vector.extract_strided_slice %288 {offsets = [0, 0], sizes = [8, 128], strides = [1, 1]} : vector<8x512xf32> to vector<8x128xf32>
    %290 = arith.negf %289 : vector<8x128xf32>
    %291 = math.exp %290 : vector<8x128xf32>
    %cst_116 = arith.constant 1.000000e+00 : f32
    %292 = vector.broadcast %cst_116 : f32 to vector<8x128xf32>
    %293 = arith.addf %292, %291 : vector<8x128xf32>
    %294 = arith.divf %292, %293 : vector<8x128xf32>
    %295 = vector.extract_strided_slice %288 {offsets = [0, 128], sizes = [8, 128], strides = [1, 1]} : vector<8x512xf32> to vector<8x128xf32>
    %296 = arith.negf %295 : vector<8x128xf32>
    %297 = math.exp %296 : vector<8x128xf32>
    %cst_117 = arith.constant 1.000000e+00 : f32
    %298 = vector.broadcast %cst_117 : f32 to vector<8x128xf32>
    %299 = arith.addf %298, %297 : vector<8x128xf32>
    %300 = arith.divf %298, %299 : vector<8x128xf32>
    %301 = vector.extract_strided_slice %288 {offsets = [0, 256], sizes = [8, 128], strides = [1, 1]} : vector<8x512xf32> to vector<8x128xf32>
    %302 = math.tanh %301 : vector<8x128xf32>
    %303 = vector.extract_strided_slice %288 {offsets = [0, 384], sizes = [8, 128], strides = [1, 1]} : vector<8x512xf32> to vector<8x128xf32>
    %304 = arith.negf %303 : vector<8x128xf32>
    %305 = math.exp %304 : vector<8x128xf32>
    %cst_118 = arith.constant 1.000000e+00 : f32
    %306 = vector.broadcast %cst_118 : f32 to vector<8x128xf32>
    %307 = arith.addf %306, %305 : vector<8x128xf32>
    %308 = arith.divf %306, %307 : vector<8x128xf32>
    %309 = arith.mulf %300, %285 : vector<8x128xf32>
    %310 = arith.mulf %294, %302 : vector<8x128xf32>
    %311 = arith.addf %309, %310 : vector<8x128xf32>
    %312 = math.tanh %311 : vector<8x128xf32>
    %313 = arith.mulf %308, %312 : vector<8x128xf32>
    %314 = arith.select %279, %311, %285 : vector<8x128xi1>, vector<8x128xf32>
    %315 = arith.select %279, %313, %284 : vector<8x128xi1>, vector<8x128xf32>
    %c0_119 = arith.constant 0 : index
    %c0_120 = arith.constant 0 : index
    %316 = vector.load %arg8[%c0_119, %c0_120] : memref<8x128xf32, #tpu.memory_space<vmem>>, vector<8x128xf32>
    tpu.vector_store %arg8[%c0_119, %c0_120], %315 {strides = array<i32>} : memref<8x128xf32, #tpu.memory_space<vmem>>, vector<8x128xf32>,
    %c0_121 = arith.constant 0 : index
    %c0_122 = arith.constant 0 : index
    %317 = vector.load %arg9[%c0_121, %c0_122] : memref<8x128xf32, #tpu.memory_space<vmem>>, vector<8x128xf32>
    tpu.vector_store %arg9[%c0_121, %c0_122], %314 {strides = array<i32>} : memref<8x128xf32, #tpu.memory_space<vmem>>, vector<8x128xf32>,
    %cst_123 = arith.constant 0.000000e+00 : f32
    %318 = vector.broadcast %cst_123 : f32 to vector<8x128xf32>
    %319 = arith.select %279, %315, %318 : vector<8x128xi1>, vector<8x128xf32>
    %320 = arith.truncf %319 : vector<8x128xf32> to vector<8x128xbf16>
    %321 = arith.index_cast %276 : i32 to index
    %c0_124 = arith.constant 0 : index
    %c0_125 = arith.constant 0 : index
    %322 = vector.load %arg5[%321, %c0_124, %c0_125] : memref<8x8x128xbf16, #tpu.memory_space<vmem>>, vector<1x8x128xbf16>
    %323 = vector.shape_cast %322 : vector<1x8x128xbf16> to vector<8x128xbf16>
    %324 = vector.shape_cast %320 : vector<8x128xbf16> to vector<1x8x128xbf16>
    tpu.vector_store %arg5[%321, %c0_124, %c0_125], %324 {strides = array<i32>} : memref<8x8x128xbf16, #tpu.memory_space<vmem>>, vector<1x8x128xbf16>,
    %c6_i32 = arith.constant 6 : i32
    %c2_i32_126 = arith.constant 2 : i32
    %325 = arith.muli %c2_i32_126, %c6_i32 : i32
    %c7_i32_127 = arith.constant 7 : i32
    %326 = arith.subi %c7_i32_127, %325 : i32
    %327 = arith.muli %arg0, %326 : i32
    %328 = arith.addi %c6_i32, %327 : i32
    %329 = arith.addi %12, %328 : i32
    %330 = vector.broadcast %329 : i32 to vector<8x128xi32>
    %331 = arith.cmpi slt, %330, %7 : vector<8x128xi32>
    %c0_128 = arith.constant 0 : index
    %332 = arith.index_cast %328 : i32 to index
    %c0_129 = arith.constant 0 : index
    %c0_130 = arith.constant 0 : index
    %333 = vector.load %arg2[%c0_128, %332, %c0_129, %c0_130] : memref<1x8x8x512xbf16, #tpu.memory_space<vmem>>, vector<1x1x8x512xbf16>
    %334 = vector.shape_cast %333 : vector<1x1x8x512xbf16> to vector<8x512xbf16>
    %335 = arith.extf %334 : vector<8x512xbf16> to vector<8x512xf32>
    %c0_131 = arith.constant 0 : index
    %c0_132 = arith.constant 0 : index
    %336 = vector.load %arg8[%c0_131, %c0_132] : memref<8x128xf32, #tpu.memory_space<vmem>>, vector<8x128xf32>
    %c0_133 = arith.constant 0 : index
    %c0_134 = arith.constant 0 : index
    %337 = vector.load %arg9[%c0_133, %c0_134] : memref<8x128xf32, #tpu.memory_space<vmem>>, vector<8x128xf32>
    %338 = arith.truncf %336 : vector<8x128xf32> to vector<8x128xbf16>
    %cst_135 = arith.constant dense<0.000000e+00> : vector<8x512xf32>
    %339 = tpu.matmul %338, %4, %cst_135 {dimension_numbers = #tpu.dot_dimension_numbers<[1], [0], [0], [1], [0, 0, 1, 1], [], []>} : vector<8x128xbf16>, vector<128x512xbf16>, vector<8x512xf32> -> vector<8x512xf32>
    %340 = arith.addf %335, %339 : vector<8x512xf32>
    %341 = vector.extract_strided_slice %340 {offsets = [0, 0], sizes = [8, 128], strides = [1, 1]} : vector<8x512xf32> to vector<8x128xf32>
    %342 = arith.negf %341 : vector<8x128xf32>
    %343 = math.exp %342 : vector<8x128xf32>
    %cst_136 = arith.constant 1.000000e+00 : f32
    %344 = vector.broadcast %cst_136 : f32 to vector<8x128xf32>
    %345 = arith.addf %344, %343 : vector<8x128xf32>
    %346 = arith.divf %344, %345 : vector<8x128xf32>
    %347 = vector.extract_strided_slice %340 {offsets = [0, 128], sizes = [8, 128], strides = [1, 1]} : vector<8x512xf32> to vector<8x128xf32>
    %348 = arith.negf %347 : vector<8x128xf32>
    %349 = math.exp %348 : vector<8x128xf32>
    %cst_137 = arith.constant 1.000000e+00 : f32
    %350 = vector.broadcast %cst_137 : f32 to vector<8x128xf32>
    %351 = arith.addf %350, %349 : vector<8x128xf32>
    %352 = arith.divf %350, %351 : vector<8x128xf32>
    %353 = vector.extract_strided_slice %340 {offsets = [0, 256], sizes = [8, 128], strides = [1, 1]} : vector<8x512xf32> to vector<8x128xf32>
    %354 = math.tanh %353 : vector<8x128xf32>
    %355 = vector.extract_strided_slice %340 {offsets = [0, 384], sizes = [8, 128], strides = [1, 1]} : vector<8x512xf32> to vector<8x128xf32>
    %356 = arith.negf %355 : vector<8x128xf32>
    %357 = math.exp %356 : vector<8x128xf32>
    %cst_138 = arith.constant 1.000000e+00 : f32
    %358 = vector.broadcast %cst_138 : f32 to vector<8x128xf32>
    %359 = arith.addf %358, %357 : vector<8x128xf32>
    %360 = arith.divf %358, %359 : vector<8x128xf32>
    %361 = arith.mulf %352, %337 : vector<8x128xf32>
    %362 = arith.mulf %346, %354 : vector<8x128xf32>
    %363 = arith.addf %361, %362 : vector<8x128xf32>
    %364 = math.tanh %363 : vector<8x128xf32>
    %365 = arith.mulf %360, %364 : vector<8x128xf32>
    %366 = arith.select %331, %363, %337 : vector<8x128xi1>, vector<8x128xf32>
    %367 = arith.select %331, %365, %336 : vector<8x128xi1>, vector<8x128xf32>
    %c0_139 = arith.constant 0 : index
    %c0_140 = arith.constant 0 : index
    %368 = vector.load %arg8[%c0_139, %c0_140] : memref<8x128xf32, #tpu.memory_space<vmem>>, vector<8x128xf32>
    tpu.vector_store %arg8[%c0_139, %c0_140], %367 {strides = array<i32>} : memref<8x128xf32, #tpu.memory_space<vmem>>, vector<8x128xf32>,
    %c0_141 = arith.constant 0 : index
    %c0_142 = arith.constant 0 : index
    %369 = vector.load %arg9[%c0_141, %c0_142] : memref<8x128xf32, #tpu.memory_space<vmem>>, vector<8x128xf32>
    tpu.vector_store %arg9[%c0_141, %c0_142], %366 {strides = array<i32>} : memref<8x128xf32, #tpu.memory_space<vmem>>, vector<8x128xf32>,
    %cst_143 = arith.constant 0.000000e+00 : f32
    %370 = vector.broadcast %cst_143 : f32 to vector<8x128xf32>
    %371 = arith.select %331, %367, %370 : vector<8x128xi1>, vector<8x128xf32>
    %372 = arith.truncf %371 : vector<8x128xf32> to vector<8x128xbf16>
    %373 = arith.index_cast %328 : i32 to index
    %c0_144 = arith.constant 0 : index
    %c0_145 = arith.constant 0 : index
    %374 = vector.load %arg5[%373, %c0_144, %c0_145] : memref<8x8x128xbf16, #tpu.memory_space<vmem>>, vector<1x8x128xbf16>
    %375 = vector.shape_cast %374 : vector<1x8x128xbf16> to vector<8x128xbf16>
    %376 = vector.shape_cast %372 : vector<8x128xbf16> to vector<1x8x128xbf16>
    tpu.vector_store %arg5[%373, %c0_144, %c0_145], %376 {strides = array<i32>} : memref<8x8x128xbf16, #tpu.memory_space<vmem>>, vector<1x8x128xbf16>,
    %c7_i32_146 = arith.constant 7 : i32
    %c2_i32_147 = arith.constant 2 : i32
    %377 = arith.muli %c2_i32_147, %c7_i32_146 : i32
    %c7_i32_148 = arith.constant 7 : i32
    %378 = arith.subi %c7_i32_148, %377 : i32
    %379 = arith.muli %arg0, %378 : i32
    %380 = arith.addi %c7_i32_146, %379 : i32
    %381 = arith.addi %12, %380 : i32
    %382 = vector.broadcast %381 : i32 to vector<8x128xi32>
    %383 = arith.cmpi slt, %382, %7 : vector<8x128xi32>
    %c0_149 = arith.constant 0 : index
    %384 = arith.index_cast %380 : i32 to index
    %c0_150 = arith.constant 0 : index
    %c0_151 = arith.constant 0 : index
    %385 = vector.load %arg2[%c0_149, %384, %c0_150, %c0_151] : memref<1x8x8x512xbf16, #tpu.memory_space<vmem>>, vector<1x1x8x512xbf16>
    %386 = vector.shape_cast %385 : vector<1x1x8x512xbf16> to vector<8x512xbf16>
    %387 = arith.extf %386 : vector<8x512xbf16> to vector<8x512xf32>
    %c0_152 = arith.constant 0 : index
    %c0_153 = arith.constant 0 : index
    %388 = vector.load %arg8[%c0_152, %c0_153] : memref<8x128xf32, #tpu.memory_space<vmem>>, vector<8x128xf32>
    %c0_154 = arith.constant 0 : index
    %c0_155 = arith.constant 0 : index
    %389 = vector.load %arg9[%c0_154, %c0_155] : memref<8x128xf32, #tpu.memory_space<vmem>>, vector<8x128xf32>
    %390 = arith.truncf %388 : vector<8x128xf32> to vector<8x128xbf16>
    %cst_156 = arith.constant dense<0.000000e+00> : vector<8x512xf32>
    %391 = tpu.matmul %390, %4, %cst_156 {dimension_numbers = #tpu.dot_dimension_numbers<[1], [0], [0], [1], [0, 0, 1, 1], [], []>} : vector<8x128xbf16>, vector<128x512xbf16>, vector<8x512xf32> -> vector<8x512xf32>
    %392 = arith.addf %387, %391 : vector<8x512xf32>
    %393 = vector.extract_strided_slice %392 {offsets = [0, 0], sizes = [8, 128], strides = [1, 1]} : vector<8x512xf32> to vector<8x128xf32>
    %394 = arith.negf %393 : vector<8x128xf32>
    %395 = math.exp %394 : vector<8x128xf32>
    %cst_157 = arith.constant 1.000000e+00 : f32
    %396 = vector.broadcast %cst_157 : f32 to vector<8x128xf32>
    %397 = arith.addf %396, %395 : vector<8x128xf32>
    %398 = arith.divf %396, %397 : vector<8x128xf32>
    %399 = vector.extract_strided_slice %392 {offsets = [0, 128], sizes = [8, 128], strides = [1, 1]} : vector<8x512xf32> to vector<8x128xf32>
    %400 = arith.negf %399 : vector<8x128xf32>
    %401 = math.exp %400 : vector<8x128xf32>
    %cst_158 = arith.constant 1.000000e+00 : f32
    %402 = vector.broadcast %cst_158 : f32 to vector<8x128xf32>
    %403 = arith.addf %402, %401 : vector<8x128xf32>
    %404 = arith.divf %402, %403 : vector<8x128xf32>
    %405 = vector.extract_strided_slice %392 {offsets = [0, 256], sizes = [8, 128], strides = [1, 1]} : vector<8x512xf32> to vector<8x128xf32>
    %406 = math.tanh %405 : vector<8x128xf32>
    %407 = vector.extract_strided_slice %392 {offsets = [0, 384], sizes = [8, 128], strides = [1, 1]} : vector<8x512xf32> to vector<8x128xf32>
    %408 = arith.negf %407 : vector<8x128xf32>
    %409 = math.exp %408 : vector<8x128xf32>
    %cst_159 = arith.constant 1.000000e+00 : f32
    %410 = vector.broadcast %cst_159 : f32 to vector<8x128xf32>
    %411 = arith.addf %410, %409 : vector<8x128xf32>
    %412 = arith.divf %410, %411 : vector<8x128xf32>
    %413 = arith.mulf %404, %389 : vector<8x128xf32>
    %414 = arith.mulf %398, %406 : vector<8x128xf32>
    %415 = arith.addf %413, %414 : vector<8x128xf32>
    %416 = math.tanh %415 : vector<8x128xf32>
    %417 = arith.mulf %412, %416 : vector<8x128xf32>
    %418 = arith.select %383, %415, %389 : vector<8x128xi1>, vector<8x128xf32>
    %419 = arith.select %383, %417, %388 : vector<8x128xi1>, vector<8x128xf32>
    %c0_160 = arith.constant 0 : index
    %c0_161 = arith.constant 0 : index
    %420 = vector.load %arg8[%c0_160, %c0_161] : memref<8x128xf32, #tpu.memory_space<vmem>>, vector<8x128xf32>
    tpu.vector_store %arg8[%c0_160, %c0_161], %419 {strides = array<i32>} : memref<8x128xf32, #tpu.memory_space<vmem>>, vector<8x128xf32>,
    %c0_162 = arith.constant 0 : index
    %c0_163 = arith.constant 0 : index
    %421 = vector.load %arg9[%c0_162, %c0_163] : memref<8x128xf32, #tpu.memory_space<vmem>>, vector<8x128xf32>
    tpu.vector_store %arg9[%c0_162, %c0_163], %418 {strides = array<i32>} : memref<8x128xf32, #tpu.memory_space<vmem>>, vector<8x128xf32>,
    %cst_164 = arith.constant 0.000000e+00 : f32
    %422 = vector.broadcast %cst_164 : f32 to vector<8x128xf32>
    %423 = arith.select %383, %419, %422 : vector<8x128xi1>, vector<8x128xf32>
    %424 = arith.truncf %423 : vector<8x128xf32> to vector<8x128xbf16>
    %425 = arith.index_cast %380 : i32 to index
    %c0_165 = arith.constant 0 : index
    %c0_166 = arith.constant 0 : index
    %426 = vector.load %arg5[%425, %c0_165, %c0_166] : memref<8x8x128xbf16, #tpu.memory_space<vmem>>, vector<1x8x128xbf16>
    %427 = vector.shape_cast %426 : vector<1x8x128xbf16> to vector<8x128xbf16>
    %428 = vector.shape_cast %424 : vector<8x128xbf16> to vector<1x8x128xbf16>
    tpu.vector_store %arg5[%425, %c0_165, %c0_166], %428 {strides = array<i32>} : memref<8x8x128xbf16, #tpu.memory_space<vmem>>, vector<1x8x128xbf16>,
    %c8_i32_167 = arith.constant 8 : i32
    %c0_i32_168 = arith.constant 0 : i32
    %429 = arith.cmpi eq, %arg1, %c0_i32_168 : i32
    %430 = arith.extui %429 : i1 to i32
    %c0_i32_169 = arith.constant 0 : i32
    %431 = arith.cmpi ne, %430, %c0_i32_169 : i32
    scf.if %431 {
      %c0_170 = arith.constant 0 : index
      %c0_171 = arith.constant 0 : index
      %432 = vector.load %arg8[%c0_170, %c0_171] : memref<8x128xf32, #tpu.memory_space<vmem>>, vector<8x128xf32>
      %c0_172 = arith.constant 0 : index
      %c0_173 = arith.constant 0 : index
      %c0_174 = arith.constant 0 : index
      %433 = vector.load %arg6[%c0_172, %c0_173, %c0_174] : memref<1x8x128xf32, #tpu.memory_space<vmem>>, vector<1x8x128xf32>
      %434 = vector.shape_cast %433 : vector<1x8x128xf32> to vector<8x128xf32>
      %435 = vector.shape_cast %432 : vector<8x128xf32> to vector<1x8x128xf32>
      tpu.vector_store %arg6[%c0_172, %c0_173, %c0_174], %435 {strides = array<i32>} : memref<1x8x128xf32, #tpu.memory_space<vmem>>, vector<1x8x128xf32>,
      %c0_175 = arith.constant 0 : index
      %c0_176 = arith.constant 0 : index
      %436 = vector.load %arg9[%c0_175, %c0_176] : memref<8x128xf32, #tpu.memory_space<vmem>>, vector<8x128xf32>
      %c0_177 = arith.constant 0 : index
      %c0_178 = arith.constant 0 : index
      %c0_179 = arith.constant 0 : index
      %437 = vector.load %arg7[%c0_177, %c0_178, %c0_179] : memref<1x8x128xf32, #tpu.memory_space<vmem>>, vector<1x8x128xf32>
      %438 = vector.shape_cast %437 : vector<1x8x128xf32> to vector<8x128xf32>
      %439 = vector.shape_cast %436 : vector<8x128xf32> to vector<1x8x128xf32>
      tpu.vector_store %arg7[%c0_177, %c0_178, %c0_179], %439 {strides = array<i32>} : memref<1x8x128xf32, #tpu.memory_space<vmem>>, vector<1x8x128xf32>,
    } else {
    }
    return
  }
  func.func @transform_0(%arg0: i32, %arg1: i32) -> (i32, i32, i32, i32) {
    %c2_i32 = arith.constant 2 : i32
    %0 = arith.muli %c2_i32, %arg1 : i32
    %c0_i32 = arith.constant 0 : i32
    %1 = arith.subi %c0_i32, %0 : i32
    %2 = arith.muli %arg0, %1 : i32
    %3 = arith.addi %arg1, %2 : i32
    %c0_i32_0 = arith.constant 0 : i32
    %c0_i32_1 = arith.constant 0 : i32
    %c0_i32_2 = arith.constant 0 : i32
    return %arg0, %3, %c0_i32_0, %c0_i32_1 : i32, i32, i32, i32
  }
  func.func @transform_1(%arg0: i32, %arg1: i32) -> (i32, i32) {
    %c0_i32 = arith.constant 0 : i32
    %c0_i32_0 = arith.constant 0 : i32
    %c0_i32_1 = arith.constant 0 : i32
    return %c0_i32, %c0_i32_0 : i32, i32
  }
  func.func @transform_2(%arg0: i32, %arg1: i32) -> (i32, i32, i32) {
    %c0_i32 = arith.constant 0 : i32
    %c0_i32_0 = arith.constant 0 : i32
    %c0_i32_1 = arith.constant 0 : i32
    return %arg0, %c0_i32, %c0_i32_0 : i32, i32, i32
  }
  func.func @transform_3(%arg0: i32, %arg1: i32) -> (i32, i32, i32) {
    %c2_i32 = arith.constant 2 : i32
    %0 = arith.muli %c2_i32, %arg1 : i32
    %c0_i32 = arith.constant 0 : i32
    %1 = arith.subi %c0_i32, %0 : i32
    %2 = arith.muli %arg0, %1 : i32
    %3 = arith.addi %arg1, %2 : i32
    %c0_i32_0 = arith.constant 0 : i32
    %c0_i32_1 = arith.constant 0 : i32
    return %3, %c0_i32_0, %arg0 : i32, i32, i32
  }
  func.func @transform_4(%arg0: i32, %arg1: i32) -> (i32, i32, i32) {
    %c0_i32 = arith.constant 0 : i32
    %c0_i32_0 = arith.constant 0 : i32
    %c0_i32_1 = arith.constant 0 : i32
    return %arg0, %c0_i32, %c0_i32_0 : i32, i32, i32
  }
  func.func @transform_5(%arg0: i32, %arg1: i32) -> (i32, i32, i32) {
    %c0_i32 = arith.constant 0 : i32
    %c0_i32_0 = arith.constant 0 : i32
    %c0_i32_1 = arith.constant 0 : i32
    return %arg0, %c0_i32, %c0_i32_0 : i32, i32, i32
  }
}

</mosaic_0001>

<bundles_post_ra>
// kernel: tpu_custom_call.1
= control target key start
LH: loop header
LB: loop body
LE: loop exit
PB: predicated region body
PF: predicated region fallthrough
CT: control target
= control target key end

     0   :  { %s3507_s0 = inlined_call_operand.hbm [shape: bf16[2,8,8,512], index: 0, kind: input, shape index: {}]   ;;  %s3508_s1 = inlined_call_operand.vmem [shape: s32[8,1], index: 1, kind: input, shape index: {}]   ;;  %s3509_s2 = inlined_call_operand.hbm [shape: bf16[2,128,512], index: 2, kind: input, shape index: {}]   ;;  %s3510_s3 = inlined_call_operand.hbm [shape: bf16[8,8,256], index: 3, kind: output, shape index: {0}]   ;;  %s3511_s4 = inlined_call_operand.hbm [shape: f32[2,8,128], index: 4, kind: output, shape index: {1}]   ;;  %s3512_s5 = inlined_call_operand.hbm [shape: f32[2,8,128], index: 5, kind: output, shape index: {2}]  }
   0x1   :  { %3518 = sst [smem:[#allocation18_spill]] %s3507_s0 }
   0x2   :  { %3519 = sst [smem:[#allocation19_spill]] %s3508_s1 }
   0x3   :  { %3520 = sst [smem:[#allocation20_spill]] %s3509_s2 }
   0x4   :  { %11 = vsyncpa [#allocation5], 0 }
   0x5   :  { %13 = vsyncpa [#allocation5 + $0x1], 0 }
   0x6   :  { %14 = vsyncpa [#allocation8], 0 }
   0x7   :  { %16 = vsyncpa [#allocation8 + $0x1], 0 }
   0x8   :  { %17 = vsyncpa [#allocation6], 0 }
   0x9   :  { %19 = vsyncpa [#allocation6 + $0x1], 0 }
   0xa   :  { %20 = vsyncpa [#allocation11], 0 }
   0xb   :  { %22 = vsyncpa [#allocation11 + $0x1], 0  ;;  %s2602_s18 = smov 0   ;;  %s2604_s19 = smov 0  }
   0xc   :  { %s2606_s20 = smov 0   ;;  %s2608_s21 = smov 0  }
   0xd   :  { %s2610_s22 = smov 0   ;;  %s2612_s23 = smov 0  }
   0xe LB: > { %s2633_s24 = sadd.s32 4294967295, %s2558_s23   ;;  %s3514_s25 = sadd.s32 4294967294, %s2558_s23   ;;  %s2558_s23 = sphi %s2612_s23, %s28_s23   ;;  %s2554_s22 = sphi %s2610_s22, %s3545_s22   ;;  %s2550_s21 = sphi %s2608_s21, %s3544_s21   ;;  %s2546_s20 = sphi %s2606_s20, %s3543_s20   ;;  %s2542_s19 = sphi %s2604_s19, %s3542_s19   ;;  %s2538_s18 = sphi %s2602_s18, %s3541_s18  }
   0xf   : > { %s40_s26 = sadd.s32 1, %s2554_s22  ;;  %s57_s27 = sadd.s32 1, %s2546_s20 }
  0x10   : > { %p42_p0 = scmp.ge.s32.totalorder %s40_s26, 2  ;;  %p64_p1 = scmp.ne.s32.totalorder %s2546_s20, %s2542_s19 }
  0x11   : > { %p65_p2 = scmp.eq.s32.totalorder %s2558_s23, 0  ;;  %p70_p3 = scmp.ne.s32.totalorder %s2542_s19, %s2538_s18 }
  0x12   : > { %s3547_s26 = smov (%p42_p0, %s40_s26), 0  ;;  %p71_p5 = scmp.eq.s32.totalorder %s2633_s24, 0 }
  0x13   : > { %3521 = sst [smem:[#allocation17_spill]] %s3547_s26  ;;  %p2645_p4 = por %p65_p2, %p64_p1 }
  0x14   : > { %s52_s29 = ssub.s32 %s2554_s22, %s3547_s26  ;;  %p151_p6 = scmp.eq.s32.totalorder %s2633_s24, 1 }
  0x15   : > { %p55_p7 = scmp.eq.s32.totalorder %s52_s29, 0  ;;  %p2653_p8 = por %p71_p5, %p70_p3 }
  0x16   : > { %p2657_p9 = por %p151_p6, %p64_p1  ;;  %p157_p10 = scmp.eq.s32.totalorder %s3514_s25, 1 }
  0x17   : > { %s3523_s30 = scalar_select %p2653_p8, 1, 0 }
  0x18   : > { %s3524_s6 = scalar_select %p2657_p9, 1, 0 }
  0x19   : > { %s2664_s7 = scalar_select %p55_p7, %s2546_s20, %s57_s27  }
  0x1a   : > { %p2666_p11 = por %p157_p10, %p70_p3  ;;  %p2086_p13 = scmp.lt.s32.totalorder %s2558_s23, 2 }
  0x1b   : > { %s2673_s9 = sand.u32 1, %s2546_s20   ;;  %s2048_s11 = sshll.u32 %s2554_s22, 11 }
  0x1c   : > { %s3525_s8 = scalar_select %p2666_p11, 1, 0 }
  0x1d   : > { %s1936_s10 = sshll.u32 %s2673_s9, 7  ;;  %s3526_s0 = sld [smem:[#allocation18_spill]] }
  0x1e   : > { %s236_s15 = scalar_lea.vmem [#allocation4], %s1936_s10  ;;  %p2686_p0 = pnand %p2086_p13, %p2645_p4 }
  0x1f   : > { %s250_s16 = sshll.u32 %s236_s15, 4  ;;  %s233_s27 = scalar_lea.sflag [#allocation5], %s2673_s9  ;;  %s2682_s16 = int_to_ptr.vmem [resolvable:$true] %s250_s16 }
  0x20   : > { %p2354_p3 = pneg %p2686_p0 }
  0x23   : > { %s2680_s14 = scalar_lea.hbm %s3526_s0, %s2048_s11  ;;  %s2357_s28 = scalar_lea.hbm %s3526_s0, 4096 }
  0x24   : > { %s2352_s29 = scalar_lea.hbm %s2680_s14, 2048  ;;  %p2358_p4 = scmp.lt.u32.totalorder %s2680_s14, %s3526_s0 }
  0x25   : > { %p2353_p2 = scmp.ne.s32.totalorder %s2680_s14, %s2352_s29  ;;  %p2359_p7 = scmp.lt.u32.totalorder %s2357_s28, %s2352_s29 }
  0x26   : > { %p2361_p13 = scmp.lt.u32.totalorder %s2352_s29, %s2680_s14 }
  0x27   : > { %p2355_p5 = pnand %p2354_p3, %p2353_p2  ;;  %p2360_p10 = por %p2359_p7, %p2358_p4 }
  0x29   : > { %p2356_p6 = pneg %p2355_p5  ;;  %p2362_p12 = por %p2361_p13, %p2360_p10 }
  0x2b   : > { %p2363_p1 = pnand %p2362_p12, %p2356_p6 }
  0x2d   : > { %2366 = shalt.err (!%p2363_p1)
}
  0x2e   : > { %s2367_s15 = scalar_lea.vmem %s2682_s16, 2048  ;;  %s2560_s10 = smov [#allocation4]  }
  0x2f   : > { %p2368_p2 = scmp.ne.s32.totalorder %s2682_s16, %s2367_s15  ;;  %s2372_s11 = sshll.u32 %s2560_s10, 4  ;;  %s2373_s11 = int_to_ptr.vmem [resolvable:$false] %s2372_s11 }
  0x30   : > { %s2374_s12 = scalar_lea.vmem %s2373_s11, 4096  ;;  %p2375_p9 = scmp.lt.s32.totalorder %s2682_s16, %s2373_s11 }
  0x31   : > { %p2370_p5 = pnand %p2368_p2, %p2354_p3  ;;  %p2376_p4 = scmp.lt.s32.totalorder %s2374_s12, %s2367_s15 }
  0x33   : > { %p2371_p11 = pneg %p2370_p5  ;;  %p2377_p7 = por %p2376_p4, %p2375_p9 }
  0x35   : > { %p2378_p10 = pnand %p2377_p7, %p2371_p11 }
  0x37   : > { %2381 = shalt.err (!%p2378_p10)
}
  0x38   : > { %s3516_s29 = smov 256   ;;  %s2562_s28 = smov 16  }
  0x39   : > { %2072 = dma.hbm_to_vmem [thread:$0]  (!%p2686_p0), %s2680_s14, 2048, %s2682_s16, %s233_s27, %s3516_s29, %s3516_s29, %s2562_s28  }
  0x3a   : > { %p279_p9 = scmp.lt.s32.totalorder %s2558_s23, 3  ;;  %s1939_s13 = sshll.u32 %s2673_s9, 8 }
  0x3b   : > { %s2049_s15 = sshll.u32 %s2554_s22, 12  ;;  %p3528_p11 = scmp.ge.s32.totalorder %s2558_s23, 1 }
  0x3c   : > { %s3530_s2 = sld [smem:[#allocation20_spill]]  ;;  %s264_s0 = scalar_lea.vmem [#allocation7], %s1939_s13 }
  0x3d   : > { %p2727_p12 = pnand %p3528_p11, %p279_p9  ;;  %s271_s26 = sshll.u32 %s264_s0, 4  ;;  %s2736_s26 = int_to_ptr.vmem [resolvable:$true] %s271_s26 }
  0x3e   : > { %s261_s14 = scalar_lea.sflag [#allocation8], %s2673_s9 }
  0x42   : > { %s2734_s25 = scalar_lea.hbm %s3530_s2, %s2049_s15  ;;  %s2387_s15 = scalar_lea.hbm %s3530_s2, 8192 }
  0x43   : > { %s2382_s16 = scalar_lea.hbm %s2734_s25, 4096  ;;  %p2388_p2 = scmp.lt.u32.totalorder %s2734_s25, %s3530_s2 }
  0x44   : > { %p2383_p1 = scmp.ne.s32.totalorder %s2734_s25, %s2382_s16  ;;  %p2389_p5 = scmp.lt.u32.totalorder %s2387_s15, %s2382_s16 }
  0x45   : > { %p2391_p7 = scmp.lt.u32.totalorder %s2382_s16, %s2734_s25 }
  0x46   : > { %p2385_p6 = pnand %p2383_p1, %p2354_p3  ;;  %p2390_p4 = por %p2389_p5, %p2388_p2 }
  0x48   : > { %p2386_p13 = pneg %p2385_p6  ;;  %p2392_p10 = por %p2391_p7, %p2390_p4 }
  0x4a   : > { %p2393_p9 = pnand %p2392_p10, %p2386_p13 }
  0x4c   : > { %2396 = shalt.err (!%p2393_p9)
}
  0x4d   : > { %s2397_s0 = scalar_lea.vmem %s2736_s26, 4096  ;;  %s2563_s29 = smov [#allocation7]  }
  0x4e   : > { %p2398_p11 = scmp.ne.s32.totalorder %s2736_s26, %s2397_s0  ;;  %s2402_s13 = sshll.u32 %s2563_s29, 4  ;;  %s2403_s13 = int_to_ptr.vmem [resolvable:$false] %s2402_s13 }
  0x4f   : > { %s2404_s27 = scalar_lea.vmem %s2403_s13, 8192  ;;  %p2405_p8 = scmp.lt.s32.totalorder %s2736_s26, %s2403_s13 }
  0x50   : > { %p2400_p1 = pnand %p2398_p11, %p2354_p3  ;;  %p2406_p2 = scmp.lt.s32.totalorder %s2404_s27, %s2397_s0 }
  0x52   : > { %p2401_p6 = pneg %p2400_p1  ;;  %p2407_p5 = por %p2406_p2, %p2405_p8 }
  0x54   : > { %p2408_p4 = pnand %p2407_p5, %p2401_p6 }
  0x56   : > { %2411 = shalt.err (!%p2408_p4)
}
  0x57   : > { %s3531_s16 = smov 256   ;;  %283 = sbr.rel (%p2727_p12) target bundleno = 2278 (0x8e6), region = 32 }
  0x58   : > { %2075 = dma.hbm_to_vmem [thread:$0]  (!%p2686_p0), %s2734_s25, 4096, %s2736_s26, %s261_s14, %s3531_s16, %s3531_s16, %s2562_s28  }
  0x59   : > { %s2770_s15 = sand.u32 (!%p2727_p12), 1, %s2542_s19   ;;  %p3532_p8 = scmp.ne.s32.totalorder (!%p2727_p12), %s3523_s30, 0 }
  0x5a   : > { %s1943_s11 = sshll.u32 (!%p2727_p12), %s2770_s15, 7  ;;  %s286_s12 = scalar_lea.sflag (!%p2727_p12), [#allocation5], %s2770_s15 }
  0x5b   : > { %s2774_s17 = scalar_lea.vmem (!%p2727_p12), [#allocation4], %s1943_s11 }
  0x5e   : > { %2521 = dma.done.wait (%p3532_p8), %s286_s12, 2048  }
  0x5f   : > { %2523 = vsyncadd (%p3532_p8), %s286_s12, 4294965248  ;;  %s1944_s25 = sshll.u32 %s2770_s15, 8  ;;  %s295_s26 = scalar_lea.sflag [#allocation8], %s2770_s15 }
  0x60   : > { %s2782_s9 = scalar_lea.vmem [#allocation7], %s1944_s25 }
  0x61   : > { %2525 = dma.done.wait (%p3532_p8), %s295_s26, 4096  }
  0x62   : > { %2527 = vsyncadd (%p3532_p8), %s295_s26, 4294963200  ;;  %v2564_v0 = vmov 0   ;;  %v2792_v1 = vld [vmem:[%s2782_s9 + $0x4] ss:$16 sps:$4 sm:$0xff]   ;;  %v2795_v2 = vld [vmem:[%s2782_s9] ss:$16 sps:$4 sm:$0xff]  }
  0x63   : > { %606 = vmatprep.mubr.bf16.mxu0 %v2564_v0  ;;  %647 = vmatprep.mubr.bf16.mxu1 %v2564_v0  ;;  %v2799_v3 = vld [vmem:[%s2782_s9 + $0x24] ss:$16 sps:$4 sm:$0xff]   ;;  %v2803_v4 = vld [vmem:[%s2782_s9 + $0x20] ss:$16 sps:$4 sm:$0xff]   ;;  %v2810_v6 = vld [vmem:[%s2782_s9 + $0xc] ss:$16 sps:$4 sm:$0xff]  }
  0x64   : > { %2143 = vset.pattern.permute.xlu0 %v2564_v0  ;;  %574 = vmatprep.subr.bf16.mxu0 %v2792_v1  ;;  %v2807_v5 = vld [vmem:[%s2782_s9 + $0x44] ss:$16 sps:$4 sm:$0xff]   ;;  %v2813_v7 = vld [vmem:[%s2782_s9 + $0x8] ss:$16 sps:$4 sm:$0xff]   ;;  %v2817_v8 = vld [vmem:[%s2782_s9 + $0x40] ss:$16 sps:$4 sm:$0xff]  }
  0x65   : > { %575 = vmatpush1.bf16.msra.mxu0 %v2795_v2  ;;  %615 = vmatprep.subr.bf16.mxu1 %v2810_v6  ;;  %v2822_v9 = vld [vmem:[%s2782_s9 + $0x64] ss:$16 sps:$4 sm:$0xff]   ;;  %v2826_v10 = vld [vmem:[%s2782_s9 + $0x2c] ss:$16 sps:$4 sm:$0xff]   ;;  %v2829_v11 = vld [vmem:[%s2782_s9 + $0x28] ss:$16 sps:$4 sm:$0xff]  }
  0x66   : > { %576 = vmatprep.subr.bf16.mxu0 %v2799_v3  ;;  %616 = vmatpush1.bf16.msra.mxu1 %v2813_v7  ;;  %v2834_v12 = vld [vmem:[%s2782_s9 + $0x60] ss:$16 sps:$4 sm:$0xff]   ;;  %v2837_v13 = vld [vmem:[%s2782_s9 + $0x84] ss:$16 sps:$4 sm:$0xff]   ;;  %v2840_v14 = vld [vmem:[%s2782_s9 + $0x4c] ss:$16 sps:$4 sm:$0xff]  }
  0x67   : > { %617 = vmatprep.subr.bf16.mxu1 %v2826_v10  ;;  %v2845_v15 = vld [vmem:[%s2782_s9 + $0x48] ss:$16 sps:$4 sm:$0xff]   ;;  %v2849_v16 = vld [vmem:[%s2782_s9 + $0x6c] ss:$16 sps:$4 sm:$0xff]   ;;  %v2853_v17 = vld [vmem:[%s2782_s9 + $0x80] ss:$16 sps:$4 sm:$0xff]  }
  0x68   : > { %v2857_v18 = vld [vmem:[%s2782_s9 + $0xa4] ss:$16 sps:$4 sm:$0xff]   ;;  %v2861_v19 = vld [vmem:[%s2782_s9 + $0x68] ss:$16 sps:$4 sm:$0xff]   ;;  %v2865_v20 = vld [vmem:[%s2782_s9 + $0x8c] ss:$16 sps:$4 sm:$0xff]  }
  0x69   : > { %577 = vmatpush1.bf16.msra.mxu0 %v2803_v4  ;;  %v2869_v21 = vld [vmem:[%s2782_s9 + $0xa0] ss:$16 sps:$4 sm:$0xff]   ;;  %v2872_v22 = vld [vmem:[%s2782_s9 + $0xc4] ss:$16 sps:$4 sm:$0xff]   ;;  %v2877_v23 = vld [vmem:[%s2782_s9 + $0x88] ss:$16 sps:$4 sm:$0xff]  }
  0x6a   : > { %578 = vmatprep.subr.bf16.mxu0 %v2807_v5  ;;  %618 = vmatpush1.bf16.msra.mxu1 %v2829_v11  ;;  %v2881_v24 = vld [vmem:[%s2782_s9 + $0xac] ss:$16 sps:$4 sm:$0xff]   ;;  %s3533_s1 = sld [smem:[#allocation19_spill]]  ;;  %v2888_v26 = vld [vmem:[%s2782_s9 + $0xc0] ss:$16 sps:$4 sm:$0xff]   ;;  %v2565_v34 = vmov 0.0|0.0  }
  0x6b   : > { %619 = vmatprep.subr.bf16.mxu1 %v2840_v14  ;;  %v2892_v27 = vld [vmem:[%s2782_s9 + $0xe4] ss:$16 sps:$4 sm:$0xff]   ;;  %v2896_v28 = vld [vmem:[%s2782_s9 + $0xa8] ss:$16 sps:$4 sm:$0xff]   ;;  %v2900_v29 = vld [vmem:[%s2782_s9 + $0xcc] ss:$16 sps:$4 sm:$0xff]  }
  0x6c   : > { %v2904_v30 = vld [vmem:[%s2782_s9 + $0xe0] ss:$16 sps:$4 sm:$0xff]   ;;  %v2909_v31 = vld [vmem:[%s2782_s9 + $0xc8] ss:$16 sps:$4 sm:$0xff]   ;;  %v2913_v32 = vld [vmem:[%s2782_s9 + $0xec] ss:$16 sps:$4 sm:$0xff]  }
  0x6d   : > { %579 = vmatpush1.bf16.msra.mxu0 %v2817_v8  ;;  %v2918_v33 = vld [vmem:[%s2782_s9 + $0xe8] ss:$16 sps:$4 sm:$0xff]   ;;  %s2050_s10 = smul.u32 112, %s2550_s21  ;;  %s1945_s29 = sshll.u32 %s2770_s15, 5 }
  0x6e   : > { %580 = vmatprep.subr.bf16.mxu0 %v2822_v9  ;;  %620 = vmatpush1.bf16.msra.mxu1 %v2845_v15  ;;  %s398_s0 = smul.u32 7, %s2550_s21  ;;  %s2981_s27 = scalar_lea.vmem [#allocation9], %s1945_s29 }
  0x6f   : > { %621 = vmatprep.subr.bf16.mxu1 %v2849_v16  ;;  %s404_s14 = scalar_lea.vmem %s2774_s17, %s2050_s10 [#allocation4]  ;;  %s2051_s13 = smul.u32 28, %s2550_s21 }
  0x70   : > { %v389_v25 = vld [vmem:[%s3533_s1] sm:$0xff]  ;;  %v406_v39 = vld [vmem:[%s404_s14 + $0x8] sm:$0xff]  ;;  %s1986_s11 = smul.u32 80, %s2550_s21  ;;  %p3536_p3 = scmp.ne.s32.totalorder %s3524_s6, 0 }
  0x71   : > { %581 = vmatpush1.bf16.msra.mxu0 %v2834_v12  ;;  %391 = vperm.xlu0 %2143, %v389_v25   ;;  %v405_v35 = vld [vmem:[%s404_s14] sm:$0xff]  ;;  %v410_v46 = vunpack.c.h.bf16 %v406_v39  ;;  %v409_v52 = vunpack.c.l.bf16 %v406_v39  ;;  %v2967_v39 = vstv %s398_s0  ;;  %s691_s16 = scalar_lea.vmem %s2981_s27, %s2051_s13 [#allocation9]  ;;  %s693_s25 = smul.u32 5, %s2550_s21 }
  0x72   : > { %582 = vmatprep.subr.bf16.mxu0 %v2837_v13  ;;  %622 = vmatpush1.bf16.msra.mxu1 %v2861_v19  ;;  %v407_v36 = vunpack.c.l.bf16 %v405_v35  ;;  %v408_v37 = vunpack.c.h.bf16 %v405_v35  ;;  %s1798_s12 = scalar_lea.vmem %s2774_s17, %s1986_s11 [#allocation4]  ;;  %s1992_s30 = smul.u32 20, %s2550_s21 }
  0x73   : > { %623 = vmatprep.subr.bf16.mxu1 %v2865_v20  ;;  %s694_s26 = sadd.s32 1, %s693_s25  ;;  %s1994_s10 = smul.u32 48, %s2550_s21 }
  0x74   : > { %s1802_s28 = scalar_lea.vmem %s2981_s27, %s1992_s30 [#allocation9]  ;;  %s829_s0 = smul.u32 3, %s2550_s21 }
  0x75   : > { %583 = vmatpush1.bf16.msra.mxu0 %v2853_v17  ;;  %s1806_s14 = scalar_lea.vmem %s2774_s17, %s1994_s10 [#allocation4]  ;;  %s2000_s13 = smul.u32 12, %s2550_s21 }
  0x76   : > { %584 = vmatprep.subr.bf16.mxu0 %v2857_v18  ;;  %624 = vmatpush1.bf16.msra.mxu1 %v2877_v23  ;;  %s830_s29 = sadd.s32 2, %s829_s0  ;;  %s2002_s11 = sshll.u32 %s2550_s21, 4 }
  0x77   : > { %625 = vmatprep.subr.bf16.mxu1 %v2881_v24  ;;  %s965_s25 = sadd.s32 3, %s2550_s21 }
  0x79   : > { %585 = vmatpush1.bf16.msra.mxu0 %v2869_v21 }
  0x7a   : > { %586 = vmatprep.subr.bf16.mxu0 %v2872_v22  ;;  %626 = vmatpush1.bf16.msra.mxu1 %v2896_v28 }
  0x7b   : > { %627 = vmatprep.subr.bf16.mxu1 %v2900_v29 }
  0x7d   : > { %587 = vmatpush1.bf16.msra.mxu0 %v2888_v26 }
  0x7e   : > { %588 = vmatprep.subr.bf16.mxu0 %v2892_v27  ;;  %628 = vmatpush1.bf16.msra.mxu1 %v2909_v31 }
  0x7f   : > { %629 = vmatprep.subr.bf16.mxu1 %v2913_v32 }
  0x81   : > { %589 = vmatpush1.bf16.msra.mxu0 %v2904_v30 }
  0x82   : > { %710 = vmatprep.subr.bf16.mxu0 %v2792_v1  ;;  %630 = vmatpush1.bf16.msra.mxu1 %v2918_v33 }
  0x83   : > { %751 = vmatprep.subr.bf16.mxu1 %v2810_v6 }
  0x84   : > { %607 = vmatmul.mubr.bf16.vlgmr.msra.gmra.mrb[0].mxu0 %v2565_v34 }
  0x85   : > { %711 = vmatpush1.bf16.msra.mxu0 %v2795_v2  ;;  %742 = vmatprep.mubr.bf16.mxu0 %v2564_v0 }
  0x86   : > { %712 = vmatprep.subr.bf16.mxu0 %v2799_v3  ;;  %648 = vmatmul.mubr.bf16.vlgmr.msra.gmra.mrb[0].mxu1 %v2565_v34 }
  0x87   : > { %752 = vmatpush1.bf16.msra.mxu1 %v2813_v7  ;;  %783 = vmatprep.mubr.bf16.mxu1 %v2564_v0 }
  0x88   : > { %753 = vmatprep.subr.bf16.mxu1 %v2826_v10 }
  0x89   : > { %713 = vmatpush1.bf16.msra.mxu0 %v2803_v4 }
  0x8a   : > { %714 = vmatprep.subr.bf16.mxu0 %v2807_v5 }
  0x8b   : > { %754 = vmatpush1.bf16.msra.mxu1 %v2829_v11 }
  0x8c   : > { %755 = vmatprep.subr.bf16.mxu1 %v2840_v14 }
  0x8d   : > { %715 = vmatpush1.bf16.msra.mxu0 %v2817_v8 }
  0x8e   : > { %716 = vmatprep.subr.bf16.mxu0 %v2822_v9 }
  0x8f   : > { %756 = vmatpush1.bf16.msra.mxu1 %v2845_v15 }
  0x90   : > { %757 = vmatprep.subr.bf16.mxu1 %v2849_v16 }
  0x91   : > { %717 = vmatpush1.bf16.msra.mxu0 %v2834_v12 }
  0x92   : > { %718 = vmatprep.subr.bf16.mxu0 %v2837_v13 }
  0x93   : > { %758 = vmatpush1.bf16.msra.mxu1 %v2861_v19 }
  0x94   : > { %759 = vmatprep.subr.bf16.mxu1 %v2865_v20 }
  0x95   : > { %719 = vmatpush1.bf16.msra.mxu0 %v2853_v17 }
  0x96   : > { %720 = vmatprep.subr.bf16.mxu0 %v2857_v18 }
  0x97   : > { %760 = vmatpush1.bf16.msra.mxu1 %v2877_v23 }
  0x98   : > { %761 = vmatprep.subr.bf16.mxu1 %v2881_v24 }
  0x99   : > { %721 = vmatpush1.bf16.msra.mxu0 %v2869_v21 }
  0x9a   : > { %722 = vmatprep.subr.bf16.mxu0 %v2872_v22 }
  0x9b   : > { %762 = vmatpush1.bf16.msra.mxu1 %v2896_v28 }
  0x9c   : > { %763 = vmatprep.subr.bf16.mxu1 %v2900_v29 }
  0x9d   : > { %723 = vmatpush1.bf16.msra.mxu0 %v2888_v26 }
  0x9e   : > { %724 = vmatprep.subr.bf16.mxu0 %v2892_v27 }
  0x9f   : > { %764 = vmatpush1.bf16.msra.mxu1 %v2909_v31 }
  0xa0   : > { %765 = vmatprep.subr.bf16.mxu1 %v2913_v32 }
  0xa1   : > { %725 = vmatpush1.bf16.msra.mxu0 %v2904_v30 }
  0xa2   : > { %846 = vmatprep.subr.bf16.mxu0 %v2792_v1 }
  0xa3   : > { %766 = vmatpush1.bf16.msra.mxu1 %v2918_v33 }
  0xa4   : > { %887 = vmatprep.subr.bf16.mxu1 %v2810_v6 }
 0x157   : > { %v608_v38 = vpop.f32.mrb[0].mxu0 }
 0x158   : > { %v656_v40 = vadd.f32 %v608_v38, %v407_v36  ;;  %v610_v41 = vpop.f32.mrb[1].mxu0  ;;  %v2965_v38 = vpop.permute.xlu0 %391 }
 0x159   : > { %v657_v42 = vadd.f32 %v610_v41, %v408_v37  ;;  %v612_v43 = vpop.f32.mrb[2].mxu0  ;;  %v649_v48 = vpop.f32.mrb[0].mxu1  ;;  %vm401_vm0 = vcmp.lt.s32.totalorder %v2967_v39, %v2965_v38 }
 0x15a   : > { %v1982_v44 = vmul.f32 -1.442695, %v656_v40  ;;  %v613_v45 = vpop.f32.mrb[3].mxu0  ;;  %v651_v49 = vpop.f32.mrb[1].mxu1  ;;  %v658_v55 = vadd.f32 %v649_v48, %v409_v52  ;;  %vm2053_vm1 = vmpackc.low %vm401_vm0, %vm401_vm0 }
 0x15b   : > { %v1983_v47 = vmul.f32 -1.442695, %v657_v42  ;;  %v659_v50 = vadd.f32 %v651_v49, %v410_v46  ;;  %v653_v51 = vpop.f32.mrb[2].mxu1  ;;  %v1987_v45 = vld [vmem:[%s1798_s12 + $0x10] sm:$0xff] }
 0x15c   : > { %2192 = vpow2.f32 %v1982_v44  ;;  %v654_v53 = vpop.f32.mrb[3].mxu1  ;;  %v703_v46 = vunpack.c.l.bf16 %v1987_v45  ;;  %v1988_v51 = vld [vmem:[%s1798_s12 + $0x18] sm:$0xff]  ;;  %s1813_s12 = scalar_lea.vmem %s2774_s17, %s2002_s11 [#allocation4]  ;;  %s1235_s11 = smul.u32 4294967293, %s2550_s21 }
 0x15d   : > { %2194 = vpow2.f32 %v1983_v47  ;;  %v1984_v54 = vmul.f32 -1.442695, %v659_v50  ;;  %v704_v47 = vunpack.c.h.bf16 %v1987_v45 }
 0x15f   : > { %2196 = vpow2.f32 %v1984_v54 }
 0x160   : > { %2198 = vtanh.f32 %v658_v55 }
 0x166   : > { %v2193_v56 = vpop.eup %2192 }
 0x167   : > { %v2195_v57 = vpop.eup %2194  ;;  %v663_v58 = vadd.f32 1.0, %v2193_v56 }
 0x168   : > { %v669_v59 = vadd.f32 1.0, %v2195_v57 }
 0x169   : > { %2200 = vrcp.f32 %v663_v58  ;;  %v2197_v60 = vpop.eup %2196 }
 0x16a   : > { %2202 = vrcp.f32 %v669_v59  ;;  %v2199_v61 = vpop.eup %2198  ;;  %v676_v63 = vadd.f32 1.0, %v2197_v60 }
 0x16c   : > { %2204 = vrcp.f32 %v676_v63  ;;  %v705_v63 = vunpack.c.l.bf16 %v1988_v51 }
 0x173   : > { %v2201_v62 = vpop.eup %2200 }
 0x174   : > { %v2203_v25 = vpop.eup %2202  ;;  %v680_v34 = vmul.f32 %v2201_v62, %v2199_v61  ;;  %v706_v61 = vunpack.c.h.bf16 %v1988_v51  ;;  %v696_v51 = vstv %s694_s26  ;;  %s2008_s26 = sshll.u32 %s2550_s21, 2 }
 0x175   : > { %v679_v35 = vmul.f32 0.0, %v2203_v25  ;;  %vm697_vm2 = vcmp.lt.s32.totalorder %v696_v51, %v2965_v38  ;;  %s1816_s30 = scalar_lea.vmem %s2981_s27, %s2008_s26 [#allocation9] }
 0x176   : > { %v2205_v37 = vpop.eup %2204 }
 0x177   : > { %v2960_v36 = vadd.f32 %v680_v34, %v679_v35 }
 0x179   : > { %2206 = vtanh.f32 %v2960_v36 }
 0x183   : > { %v2207_v40 = vpop.eup %2206 }
 0x184   : > { %v683_v41 = vmul.f32 %v2207_v40, %v2205_v37 }
 0x186   : > { %v2979_v42 = vsel %vm401_vm0, %v683_v41, 0.0  ;;  %v2054_v43 = vpack.c.bf16 %v683_v41, %v683_v41 }
 0x187   : > { %v689_v44 = vpack.c.bf16 %v2979_v42, %v2979_v42 }
 0x188   : > { %2055 = vmatmul.mubr.msk.bf16.vlgmr.msra.gmra.mrb[4].mxu0 %vm2053_vm1, %v2054_v43  ;;  %2058 = vmatmul.mubr.msk.bf16.vlgmr.msra.gmra.mrb[4].mxu1 %vm2053_vm1, %v2054_v43 }
 0x189   : > { %692 = vst [vmem:[%s691_s16] sm:$0xf] %v689_v44  ;;  %847 = vmatpush1.bf16.msra.mxu0 %v2795_v2  ;;  %888 = vmatpush1.bf16.msra.mxu1 %v2813_v7  ;;  %s1810_s16 = scalar_lea.vmem %s2981_s27, %s2000_s13 [#allocation9]  ;;  %s2016_s13 = smul.u32 4294967248, %s2550_s21 }
 0x18a   : > { %848 = vmatprep.subr.bf16.mxu0 %v2799_v3  ;;  %889 = vmatprep.subr.bf16.mxu1 %v2826_v10 }
 0x18b   : > { %878 = vmatprep.mubr.bf16.mxu0 %v2564_v0  ;;  %919 = vmatprep.mubr.bf16.mxu1 %v2564_v0 }
 0x18d   : > { %849 = vmatpush1.bf16.msra.mxu0 %v2803_v4  ;;  %890 = vmatpush1.bf16.msra.mxu1 %v2829_v11 }
 0x18e   : > { %850 = vmatprep.subr.bf16.mxu0 %v2807_v5  ;;  %891 = vmatprep.subr.bf16.mxu1 %v2840_v14 }
 0x191   : > { %851 = vmatpush1.bf16.msra.mxu0 %v2817_v8  ;;  %892 = vmatpush1.bf16.msra.mxu1 %v2845_v15 }
 0x192   : > { %852 = vmatprep.subr.bf16.mxu0 %v2822_v9  ;;  %893 = vmatprep.subr.bf16.mxu1 %v2849_v16 }
 0x195   : > { %853 = vmatpush1.bf16.msra.mxu0 %v2834_v12  ;;  %894 = vmatpush1.bf16.msra.mxu1 %v2861_v19 }
 0x196   : > { %854 = vmatprep.subr.bf16.mxu0 %v2837_v13  ;;  %895 = vmatprep.subr.bf16.mxu1 %v2865_v20 }
 0x199   : > { %855 = vmatpush1.bf16.msra.mxu0 %v2853_v17  ;;  %896 = vmatpush1.bf16.msra.mxu1 %v2877_v23 }
 0x19a   : > { %856 = vmatprep.subr.bf16.mxu0 %v2857_v18  ;;  %897 = vmatprep.subr.bf16.mxu1 %v2881_v24 }
 0x19d   : > { %857 = vmatpush1.bf16.msra.mxu0 %v2869_v21  ;;  %898 = vmatpush1.bf16.msra.mxu1 %v2896_v28 }
 0x19e   : > { %858 = vmatprep.subr.bf16.mxu0 %v2872_v22  ;;  %899 = vmatprep.subr.bf16.mxu1 %v2900_v29 }
 0x1a1   : > { %859 = vmatpush1.bf16.msra.mxu0 %v2888_v26  ;;  %900 = vmatpush1.bf16.msra.mxu1 %v2909_v31 }
 0x1a2   : > { %860 = vmatprep.subr.bf16.mxu0 %v2892_v27  ;;  %901 = vmatprep.subr.bf16.mxu1 %v2913_v32 }
 0x1a5   : > { %861 = vmatpush1.bf16.msra.mxu0 %v2904_v30  ;;  %902 = vmatpush1.bf16.msra.mxu1 %v2918_v33 }
 0x1a6   : > { %981 = vmatprep.subr.bf16.mxu0 %v2792_v1  ;;  %1022 = vmatprep.subr.bf16.mxu1 %v2810_v6 }
 0x25b   : > { %v744_v48 = vpop.f32.mrb[4].mxu0  ;;  %v785_v49 = vpop.f32.mrb[4].mxu1 }
 0x25c   : > { %v792_v50 = vadd.f32 %v744_v48, %v703_v46  ;;  %v746_v52 = vpop.f32.mrb[5].mxu0  ;;  %v787_v53 = vpop.f32.mrb[5].mxu1  ;;  %v794_v34 = vadd.f32 %v785_v49, %v705_v63 }
 0x25d   : > { %v793_v54 = vadd.f32 %v746_v52, %v704_v47  ;;  %v748_v55 = vpop.f32.mrb[6].mxu0  ;;  %v789_v56 = vpop.f32.mrb[6].mxu1  ;;  %v795_v62 = vadd.f32 %v787_v53, %v706_v61  ;;  %v684_v47 = vsel %vm401_vm0, %v2960_v36, 0.0 }
 0x25e   : > { %v1989_v57 = vmul.f32 -1.442695, %v792_v50  ;;  %v749_v58 = vpop.f32.mrb[7].mxu0  ;;  %v790_v59 = vpop.f32.mrb[7].mxu1 }
 0x25f   : > { %v1990_v60 = vmul.f32 -1.442695, %v793_v54  ;;  %v1991_v25 = vmul.f32 -1.442695, %v795_v62 }
 0x260   : > { %2208 = vpow2.f32 %v1989_v57 }
 0x261   : > { %2210 = vpow2.f32 %v1990_v60 }
 0x262   : > { %2212 = vpow2.f32 %v1991_v25  ;;  %v1996_v25 = vld [vmem:[%s1806_s14 + $0x28] sm:$0xff] }
 0x263   : > { %2214 = vtanh.f32 %v794_v34 }
 0x26a   : > { %v2209_v35 = vpop.eup %2208 }
 0x26b   : > { %v2211_v37 = vpop.eup %2210  ;;  %v799_v40 = vadd.f32 1.0, %v2209_v35 }
 0x26c   : > { %v805_v41 = vadd.f32 1.0, %v2211_v37  ;;  %v2213_v43 = vpop.eup %2212 }
 0x26d   : > { %2216 = vrcp.f32 %v799_v40  ;;  %v2215_v44 = vpop.eup %2214  ;;  %v812_v49 = vadd.f32 1.0, %v2213_v43 }
 0x26e   : > { %2218 = vrcp.f32 %v805_v41 }
 0x26f   : > { %2220 = vrcp.f32 %v812_v49  ;;  %v841_v49 = vunpack.c.l.bf16 %v1996_v25 }
 0x277   : > { %v2217_v45 = vpop.eup %2216 }
 0x278   : > { %v2219_v46 = vpop.eup %2218  ;;  %v816_v48 = vmul.f32 %v2217_v45, %v2215_v44 }
 0x279   : > { %v815_v50 = vmul.f32 %v2219_v46, %v684_v47  ;;  %v2221_v54 = vpop.eup %2220 }
 0x27b   : > { %v817_v52 = vadd.f32 %v816_v48, %v815_v50 }
 0x27d   : > { %2222 = vtanh.f32 %v817_v52  ;;  %v3028_v53 = vsel %vm697_vm2, %v817_v52, %v684_v47  ;;  %v842_v47 = vunpack.c.h.bf16 %v1996_v25 }
 0x287   : > { %v2223_v55 = vpop.eup %2222 }
 0x288   : > { %v819_v56 = vmul.f32 %v2223_v55, %v2221_v54 }
 0x28a   : > { %v3032_v57 = vsel %vm697_vm2, %v819_v56, %v2979_v42  ;;  %v824_v36 = vsel %vm697_vm2, %v819_v56, 0.0  ;;  %v1995_v42 = vld [vmem:[%s1806_s14 + $0x20] sm:$0xff] }
 0x28b   : > { %v825_v39 = vpack.c.bf16 %v824_v36, %v824_v36  ;;  %v845_v58 = vpack.c.bf16 %v3032_v57, %v3032_v57  ;;  %v839_v59 = vunpack.c.l.bf16 %v1995_v42  ;;  %v840_v60 = vunpack.c.h.bf16 %v1995_v42 }
 0x28d   : > { %1993 = vst [vmem:[%s1802_s28 + $0x4] sm:$0xf] %v825_v39  ;;  %879 = vmatmul.mubr.bf16.vlgmr.msra.gmra.mrb[8].mxu0 %v845_v58  ;;  %920 = vmatmul.mubr.bf16.vlgmr.msra.gmra.mrb[8].mxu1 %v845_v58  ;;  %s3170_s28 = ssub.s32 4, %s2550_s21 }
 0x28e   : > { %982 = vmatpush1.bf16.msra.mxu0 %v2795_v2  ;;  %1023 = vmatpush1.bf16.msra.mxu1 %v2813_v7  ;;  %s2052_s10 = sshll.u32 %s3170_s28, 4  ;;  %s2015_s0 = sshll.u32 %s3170_s28, 2 }
 0x28f   : > { %983 = vmatprep.subr.bf16.mxu0 %v2799_v3  ;;  %1024 = vmatprep.subr.bf16.mxu1 %v2826_v10  ;;  %s1106_s14 = scalar_lea.vmem %s2774_s17, %s2052_s10 [#allocation4] }
 0x290   : > { %1013 = vmatprep.mubr.bf16.mxu0 %v2564_v0  ;;  %1054 = vmatprep.mubr.bf16.mxu1 %v2564_v0 }
 0x292   : > { %984 = vmatpush1.bf16.msra.mxu0 %v2803_v4  ;;  %1025 = vmatpush1.bf16.msra.mxu1 %v2829_v11 }
 0x293   : > { %985 = vmatprep.subr.bf16.mxu0 %v2807_v5  ;;  %1026 = vmatprep.subr.bf16.mxu1 %v2840_v14 }
 0x296   : > { %986 = vmatpush1.bf16.msra.mxu0 %v2817_v8  ;;  %1027 = vmatpush1.bf16.msra.mxu1 %v2845_v15 }
 0x297   : > { %987 = vmatprep.subr.bf16.mxu0 %v2822_v9  ;;  %1028 = vmatprep.subr.bf16.mxu1 %v2849_v16 }
 0x29a   : > { %988 = vmatpush1.bf16.msra.mxu0 %v2834_v12  ;;  %1029 = vmatpush1.bf16.msra.mxu1 %v2861_v19 }
 0x29b   : > { %989 = vmatprep.subr.bf16.mxu0 %v2837_v13  ;;  %1030 = vmatprep.subr.bf16.mxu1 %v2865_v20 }
 0x29e   : > { %990 = vmatpush1.bf16.msra.mxu0 %v2853_v17  ;;  %1031 = vmatpush1.bf16.msra.mxu1 %v2877_v23 }
 0x29f   : > { %991 = vmatprep.subr.bf16.mxu0 %v2857_v18  ;;  %1032 = vmatprep.subr.bf16.mxu1 %v2881_v24 }
 0x2a2   : > { %992 = vmatpush1.bf16.msra.mxu0 %v2869_v21  ;;  %1033 = vmatpush1.bf16.msra.mxu1 %v2896_v28 }
 0x2a3   : > { %993 = vmatprep.subr.bf16.mxu0 %v2872_v22  ;;  %1034 = vmatprep.subr.bf16.mxu1 %v2900_v29 }
 0x2a6   : > { %994 = vmatpush1.bf16.msra.mxu0 %v2888_v26  ;;  %1035 = vmatpush1.bf16.msra.mxu1 %v2909_v31 }
 0x2a7   : > { %995 = vmatprep.subr.bf16.mxu0 %v2892_v27  ;;  %1036 = vmatprep.subr.bf16.mxu1 %v2913_v32 }
 0x2aa   : > { %996 = vmatpush1.bf16.msra.mxu0 %v2904_v30  ;;  %1037 = vmatpush1.bf16.msra.mxu1 %v2918_v33 }
 0x2ab   : > { %1116 = vmatprep.subr.bf16.mxu0 %v2792_v1  ;;  %1157 = vmatprep.subr.bf16.mxu1 %v2810_v6 }
 0x360   : > { %v880_v61 = vpop.f32.mrb[8].mxu0  ;;  %v921_v62 = vpop.f32.mrb[8].mxu1 }
 0x361   : > { %v928_v63 = vadd.f32 %v880_v61, %v839_v59  ;;  %v882_v34 = vpop.f32.mrb[9].mxu0  ;;  %v923_v35 = vpop.f32.mrb[9].mxu1  ;;  %v930_v51 = vadd.f32 %v921_v62, %v841_v49  ;;  %v832_v62 = vstv %s830_s29  ;;  %v2004_v49 = vld [vmem:[%s1813_s12 + $0x38] sm:$0xff]  ;;  %s1233_s29 = scalar_lea.vmem %s2981_s27, %s2015_s0 [#allocation9] }
 0x362   : > { %v929_v37 = vadd.f32 %v882_v34, %v840_v60  ;;  %v884_v40 = vpop.f32.mrb[10].mxu0  ;;  %v925_v41 = vpop.f32.mrb[10].mxu1  ;;  %v931_v48 = vadd.f32 %v923_v35, %v842_v47  ;;  %vm833_vm3 = vcmp.lt.s32.totalorder %v832_v62, %v2965_v38 }
 0x363   : > { %v1997_v43 = vmul.f32 -1.442695, %v928_v63  ;;  %v885_v44 = vpop.f32.mrb[11].mxu0  ;;  %v926_v45 = vpop.f32.mrb[11].mxu1 }
 0x364   : > { %v1998_v46 = vmul.f32 -1.442695, %v929_v37  ;;  %v1999_v50 = vmul.f32 -1.442695, %v931_v48 }
 0x365   : > { %2224 = vpow2.f32 %v1997_v43 }
 0x366   : > { %2226 = vpow2.f32 %v1998_v46 }
 0x367   : > { %2228 = vpow2.f32 %v1999_v50 }
 0x368   : > { %2230 = vtanh.f32 %v930_v51 }
 0x36f   : > { %v2225_v52 = vpop.eup %2224 }
 0x370   : > { %v2227_v54 = vpop.eup %2226  ;;  %v935_v55 = vadd.f32 1.0, %v2225_v52 }
 0x371   : > { %v941_v56 = vadd.f32 1.0, %v2227_v54  ;;  %v2229_v36 = vpop.eup %2228 }
 0x372   : > { %2232 = vrcp.f32 %v935_v55  ;;  %v2231_v39 = vpop.eup %2230  ;;  %v948_v60 = vadd.f32 1.0, %v2229_v36 }
 0x373   : > { %2234 = vrcp.f32 %v941_v56 }
 0x374   : > { %2236 = vrcp.f32 %v948_v60  ;;  %v976_v60 = vunpack.c.l.bf16 %v2004_v49 }
 0x37c   : > { %v2233_v58 = vpop.eup %2232 }
 0x37d   : > { %v2235_v42 = vpop.eup %2234  ;;  %v952_v59 = vmul.f32 %v2233_v58, %v2231_v39 }
 0x37e   : > { %v951_v61 = vmul.f32 %v2235_v42, %v3028_v53  ;;  %v2237_v34 = vpop.eup %2236  ;;  %v977_v42 = vunpack.c.h.bf16 %v2004_v49 }
 0x380   : > { %v953_v63 = vadd.f32 %v952_v59, %v951_v61 }
 0x382   : > { %2238 = vtanh.f32 %v953_v63  ;;  %v3077_v25 = vsel %vm833_vm3, %v953_v63, %v3028_v53  ;;  %v2003_v53 = vld [vmem:[%s1813_s12 + $0x30] sm:$0xff]  ;;  %s1236_s12 = sadd.s32 5, %s1235_s11  ;;  %s1946_s11 = sshll.u32 %s2770_s15, 3 }
 0x383   : > { %v975_v45 = vunpack.c.h.bf16 %v2003_v53 }
 0x38c   : > { %v2239_v35 = vpop.eup %2238 }
 0x38d   : > { %v955_v37 = vmul.f32 %v2239_v35, %v2237_v34 }
 0x38f   : > { %v3081_v40 = vsel %vm833_vm3, %v955_v37, %v3032_v57  ;;  %v960_v41 = vsel %vm833_vm3, %v955_v37, 0.0  ;;  %v974_v57 = vunpack.c.l.bf16 %v2003_v53 }
 0x390   : > { %v961_v43 = vpack.c.bf16 %v960_v41, %v960_v41  ;;  %v980_v44 = vpack.c.bf16 %v3081_v40, %v3081_v40 }
 0x392   : > { %2001 = vst [vmem:[%s1810_s16 + $0x8] sm:$0xf] %v961_v43  ;;  %1014 = vmatmul.mubr.bf16.vlgmr.msra.gmra.mrb[12].mxu0 %v980_v44  ;;  %1055 = vmatmul.mubr.bf16.vlgmr.msra.gmra.mrb[12].mxu1 %v980_v44  ;;  %s1824_s16 = scalar_lea.vmem %s2774_s17, %s2016_s13 [#allocation4] }
 0x393   : > { %1117 = vmatpush1.bf16.msra.mxu0 %v2795_v2  ;;  %1158 = vmatpush1.bf16.msra.mxu1 %v2813_v7 }
 0x394   : > { %1118 = vmatprep.subr.bf16.mxu0 %v2799_v3  ;;  %1159 = vmatprep.subr.bf16.mxu1 %v2826_v10 }
 0x395   : > { %1148 = vmatprep.mubr.bf16.mxu0 %v2564_v0  ;;  %1189 = vmatprep.mubr.bf16.mxu1 %v2564_v0 }
 0x397   : > { %1119 = vmatpush1.bf16.msra.mxu0 %v2803_v4  ;;  %1160 = vmatpush1.bf16.msra.mxu1 %v2829_v11 }
 0x398   : > { %1120 = vmatprep.subr.bf16.mxu0 %v2807_v5  ;;  %1161 = vmatprep.subr.bf16.mxu1 %v2840_v14 }
 0x39b   : > { %1121 = vmatpush1.bf16.msra.mxu0 %v2817_v8  ;;  %1162 = vmatpush1.bf16.msra.mxu1 %v2845_v15 }
 0x39c   : > { %1122 = vmatprep.subr.bf16.mxu0 %v2822_v9  ;;  %1163 = vmatprep.subr.bf16.mxu1 %v2849_v16 }
 0x39f   : > { %1123 = vmatpush1.bf16.msra.mxu0 %v2834_v12  ;;  %1164 = vmatpush1.bf16.msra.mxu1 %v2861_v19 }
 0x3a0   : > { %1124 = vmatprep.subr.bf16.mxu0 %v2837_v13  ;;  %1165 = vmatprep.subr.bf16.mxu1 %v2865_v20 }
 0x3a3   : > { %1125 = vmatpush1.bf16.msra.mxu0 %v2853_v17  ;;  %1166 = vmatpush1.bf16.msra.mxu1 %v2877_v23 }
 0x3a4   : > { %1126 = vmatprep.subr.bf16.mxu0 %v2857_v18  ;;  %1167 = vmatprep.subr.bf16.mxu1 %v2881_v24 }
 0x3a7   : > { %1127 = vmatpush1.bf16.msra.mxu0 %v2869_v21  ;;  %1168 = vmatpush1.bf16.msra.mxu1 %v2896_v28 }
 0x3a8   : > { %1128 = vmatprep.subr.bf16.mxu0 %v2872_v22  ;;  %1169 = vmatprep.subr.bf16.mxu1 %v2900_v29 }
 0x3ab   : > { %1129 = vmatpush1.bf16.msra.mxu0 %v2888_v26  ;;  %1170 = vmatpush1.bf16.msra.mxu1 %v2909_v31 }
 0x3ac   : > { %1130 = vmatprep.subr.bf16.mxu0 %v2892_v27  ;;  %1171 = vmatprep.subr.bf16.mxu1 %v2913_v32 }
 0x3af   : > { %1131 = vmatpush1.bf16.msra.mxu0 %v2904_v30  ;;  %1172 = vmatpush1.bf16.msra.mxu1 %v2918_v33 }
 0x3b0   : > { %1252 = vmatprep.subr.bf16.mxu0 %v2792_v1  ;;  %1293 = vmatprep.subr.bf16.mxu1 %v2810_v6 }
 0x465   : > { %v1015_v46 = vpop.f32.mrb[12].mxu0  ;;  %v1056_v47 = vpop.f32.mrb[12].mxu1 }
 0x466   : > { %v1063_v48 = vadd.f32 %v1015_v46, %v974_v57  ;;  %v1017_v50 = vpop.f32.mrb[13].mxu0  ;;  %v1058_v51 = vpop.f32.mrb[13].mxu1  ;;  %v1065_v62 = vadd.f32 %v1056_v47, %v976_v60  ;;  %v967_v47 = vstv %s965_s25  ;;  %s2022_s25 = smul.u32 4294967284, %s2550_s21 }
 0x467   : > { %v1064_v52 = vadd.f32 %v1017_v50, %v975_v45  ;;  %v1019_v54 = vpop.f32.mrb[14].mxu0  ;;  %v1060_v55 = vpop.f32.mrb[14].mxu1  ;;  %v1066_v59 = vadd.f32 %v1058_v51, %v977_v42  ;;  %vm968_vm4 = vcmp.lt.s32.totalorder %v967_v47, %v2965_v38  ;;  %v3218_v47 = vld [vmem:[%s2782_s9 + $0x4c] ss:$16 sps:$4 sm:$0xff]  }
 0x468   : > { %v2005_v56 = vmul.f32 -1.442695, %v1063_v48  ;;  %v1020_v36 = vpop.f32.mrb[15].mxu0  ;;  %v1061_v39 = vpop.f32.mrb[15].mxu1  ;;  %s1828_s26 = scalar_lea.vmem %s2981_s27, %s2022_s25 [#allocation9]  ;;  %s2038_s25 = smul.u32 4294967268, %s2550_s21 }
 0x469   : > { %v2006_v58 = vmul.f32 -1.442695, %v1064_v52  ;;  %v2007_v61 = vmul.f32 -1.442695, %v1066_v59  ;;  %v1102_v39 = vstv %s3170_s28 }
 0x46a   : > { %2240 = vpow2.f32 %v2005_v56  ;;  %vm1103_vm5 = vcmp.lt.s32.totalorder %v1102_v39, %v2965_v38 }
 0x46b   : > { %2242 = vpow2.f32 %v2006_v58 }
 0x46c   : > { %2244 = vpow2.f32 %v2007_v61 }
 0x46d   : > { %2246 = vtanh.f32 %v1065_v62 }
 0x474   : > { %v2241_v63 = vpop.eup %2240 }
 0x475   : > { %v2243_v34 = vpop.eup %2242  ;;  %v1070_v35 = vadd.f32 1.0, %v2241_v63 }
 0x476   : > { %v1076_v37 = vadd.f32 1.0, %v2243_v34  ;;  %v2245_v41 = vpop.eup %2244 }
 0x477   : > { %2248 = vrcp.f32 %v1070_v35  ;;  %v2247_v43 = vpop.eup %2246  ;;  %v1083_v45 = vadd.f32 1.0, %v2245_v41  ;;  %v3188_v41 = vld [vmem:[%s2782_s9] ss:$16 sps:$4 sm:$0xff]  }
 0x478   : > { %2250 = vrcp.f32 %v1076_v37 }
 0x479   : > { %2252 = vrcp.f32 %v1083_v45  ;;  %v3210_v45 = vld [vmem:[%s2782_s9 + $0x28] ss:$16 sps:$4 sm:$0xff]  }
 0x481   : > { %v2249_v44 = vpop.eup %2248 }
 0x482   : > { %v2251_v53 = vpop.eup %2250  ;;  %v1087_v57 = vmul.f32 %v2249_v44, %v2247_v43  ;;  %v3192_v43 = vld [vmem:[%s2782_s9 + $0x8] ss:$16 sps:$4 sm:$0xff]   ;;  %v3196_v44 = vld [vmem:[%s2782_s9 + $0x24] ss:$16 sps:$4 sm:$0xff]  }
 0x483   : > { %v1086_v46 = vmul.f32 %v2251_v53, %v3077_v25  ;;  %v2253_v50 = vpop.eup %2252  ;;  %v3200_v53 = vld [vmem:[%s2782_s9 + $0x2c] ss:$16 sps:$4 sm:$0xff]  }
 0x485   : > { %v1088_v48 = vadd.f32 %v1087_v57, %v1086_v46  ;;  %v3206_v57 = vld [vmem:[%s2782_s9 + $0x20] ss:$16 sps:$4 sm:$0xff]   ;;  %v3214_v46 = vld [vmem:[%s2782_s9 + $0x44] ss:$16 sps:$4 sm:$0xff]  }
 0x487   : > { %2254 = vtanh.f32 %v1088_v48  ;;  %v3126_v49 = vsel %vm968_vm4, %v1088_v48, %v3077_v25  ;;  %v3222_v48 = vld [vmem:[%s2782_s9 + $0x40] ss:$16 sps:$4 sm:$0xff]  }
 0x491   : > { %v2255_v51 = vpop.eup %2254 }
 0x492   : > { %v1090_v52 = vmul.f32 %v2255_v51, %v2253_v50  ;;  %v3230_v50 = vld [vmem:[%s2782_s9 + $0x64] ss:$16 sps:$4 sm:$0xff]   ;;  %v3234_v51 = vld [vmem:[%s2782_s9 + $0x6c] ss:$16 sps:$4 sm:$0xff]  }
 0x494   : > { %v3130_v54 = vsel %vm968_vm4, %v1090_v52, %v3081_v40  ;;  %v1095_v55 = vsel %vm968_vm4, %v1090_v52, 0.0  ;;  %v3238_v52 = vld [vmem:[%s2782_s9 + $0x60] ss:$16 sps:$4 sm:$0xff]  }
 0x495   : > { %v1096_v56 = vpack.c.bf16 %v1095_v55, %v1095_v55  ;;  %v1115_v36 = vpack.c.bf16 %v3130_v54, %v3130_v54  ;;  %v3246_v55 = vld [vmem:[%s2782_s9 + $0x84] ss:$16 sps:$4 sm:$0xff]  }
 0x497   : > { %2009 = vst [vmem:[%s1816_s30 + $0xc] sm:$0xf] %v1096_v56  ;;  %1149 = vmatmul.mubr.bf16.vlgmr.msra.gmra.mrb[16].mxu0 %v1115_v36  ;;  %1190 = vmatmul.mubr.bf16.vlgmr.msra.gmra.mrb[16].mxu1 %v1115_v36  ;;  %v3250_v56 = vld [vmem:[%s2782_s9 + $0x8c] ss:$16 sps:$4 sm:$0xff]   ;;  %v3254_v36 = vld [vmem:[%s2782_s9 + $0x80] ss:$16 sps:$4 sm:$0xff]  }
 0x498   : > { %1253 = vmatpush1.bf16.msra.mxu0 %v2795_v2  ;;  %1294 = vmatpush1.bf16.msra.mxu1 %v2813_v7  ;;  %v1107_v2 = vld [vmem:[%s1106_s14] sm:$0xff]  ;;  %s2024_s30 = smul.u32 4294967216, %s2550_s21 }
 0x499   : > { %1254 = vmatprep.subr.bf16.mxu0 %v2799_v3  ;;  %1295 = vmatprep.subr.bf16.mxu1 %v2826_v10  ;;  %v1109_v3 = vunpack.c.l.bf16 %v1107_v2 }
 0x49a   : > { %1284 = vmatprep.mubr.bf16.mxu0 %v2564_v0  ;;  %1325 = vmatprep.mubr.bf16.mxu1 %v2564_v0  ;;  %s1832_s28 = scalar_lea.vmem %s2774_s17, %s2024_s30 [#allocation4]  ;;  %s2044_s30 = sshll.u32 %s2550_s21, 7 }
 0x49b   : > { %s3393_s2 = scalar_lea.hbm %s3512_s5, %s2044_s30 }
 0x49c   : > { %1255 = vmatpush1.bf16.msra.mxu0 %v2803_v4  ;;  %1296 = vmatpush1.bf16.msra.mxu1 %v2829_v11  ;;  %v1110_v4 = vunpack.c.h.bf16 %v1107_v2  ;;  %v3258_v2 = vld [vmem:[%s2782_s9 + $0x88] ss:$16 sps:$4 sm:$0xff]  }
 0x49d   : > { %1256 = vmatprep.subr.bf16.mxu0 %v2807_v5  ;;  %1297 = vmatprep.subr.bf16.mxu1 %v2840_v14 }
 0x4a0   : > { %1257 = vmatpush1.bf16.msra.mxu0 %v2817_v8  ;;  %1298 = vmatpush1.bf16.msra.mxu1 %v2845_v15 }
 0x4a1   : > { %1258 = vmatprep.subr.bf16.mxu0 %v2822_v9  ;;  %1299 = vmatprep.subr.bf16.mxu1 %v2849_v16  ;;  %v1108_v9 = vld [vmem:[%s1106_s14 + $0x8] sm:$0xff]  ;;  %s2030_s14 = smul.u32 4294967276, %s2550_s21 }
 0x4a3   : > { %s1836_s0 = scalar_lea.vmem %s2981_s27, %s2030_s14 [#allocation9]  ;;  %s3386_s14 = scalar_lea.hbm %s3511_s4, %s2044_s30 }
 0x4a4   : > { %1259 = vmatpush1.bf16.msra.mxu0 %v2834_v12  ;;  %1300 = vmatpush1.bf16.msra.mxu1 %v2861_v19  ;;  %v1111_v19 = vunpack.c.l.bf16 %v1108_v9 }
 0x4a5   : > { %1260 = vmatprep.subr.bf16.mxu0 %v2837_v13  ;;  %1301 = vmatprep.subr.bf16.mxu1 %v2865_v20 }
 0x4a8   : > { %1261 = vmatpush1.bf16.msra.mxu0 %v2853_v17  ;;  %1302 = vmatpush1.bf16.msra.mxu1 %v2877_v23  ;;  %v1112_v17 = vunpack.c.h.bf16 %v1108_v9  ;;  %v3282_v9 = vld [vmem:[%s2782_s9 + $0xcc] ss:$16 sps:$4 sm:$0xff]  }
 0x4a9   : > { %1262 = vmatprep.subr.bf16.mxu0 %v2857_v18  ;;  %1303 = vmatprep.subr.bf16.mxu1 %v2881_v24 }
 0x4ac   : > { %1263 = vmatpush1.bf16.msra.mxu0 %v2869_v21  ;;  %1304 = vmatpush1.bf16.msra.mxu1 %v2896_v28 }
 0x4ad   : > { %1264 = vmatprep.subr.bf16.mxu0 %v2872_v22  ;;  %1305 = vmatprep.subr.bf16.mxu1 %v2900_v29 }
 0x4b0   : > { %1265 = vmatpush1.bf16.msra.mxu0 %v2888_v26  ;;  %1306 = vmatpush1.bf16.msra.mxu1 %v2909_v31 }
 0x4b1   : > { %1266 = vmatprep.subr.bf16.mxu0 %v2892_v27  ;;  %1307 = vmatprep.subr.bf16.mxu1 %v2913_v32 }
 0x4b4   : > { %1267 = vmatpush1.bf16.msra.mxu0 %v2904_v30  ;;  %1308 = vmatpush1.bf16.msra.mxu1 %v2918_v33 }
 0x4b5   : > { %1388 = vmatprep.subr.bf16.mxu0 %v2792_v1  ;;  %1429 = vmatprep.subr.bf16.mxu1 %v2810_v6 }
 0x56a   : > { %v1150_v5 = vpop.f32.mrb[16].mxu0  ;;  %v1191_v7 = vpop.f32.mrb[16].mxu1 }
 0x56b   : > { %v1198_v8 = vadd.f32 %v1150_v5, %v1109_v3  ;;  %v1152_v10 = vpop.f32.mrb[17].mxu0  ;;  %v1193_v11 = vpop.f32.mrb[17].mxu1  ;;  %v1200_v21 = vadd.f32 %v1191_v7, %v1111_v19  ;;  %v3262_v3 = vld [vmem:[%s2782_s9 + $0xa4] ss:$16 sps:$4 sm:$0xff]   ;;  %v3270_v5 = vld [vmem:[%s2782_s9 + $0xa0] ss:$16 sps:$4 sm:$0xff]  }
 0x56c   : > { %v1199_v12 = vadd.f32 %v1152_v10, %v1110_v4  ;;  %v1154_v13 = vpop.f32.mrb[18].mxu0  ;;  %v1195_v14 = vpop.f32.mrb[18].mxu1  ;;  %v1201_v18 = vadd.f32 %v1193_v11, %v1112_v17  ;;  %v3266_v4 = vld [vmem:[%s2782_s9 + $0xac] ss:$16 sps:$4 sm:$0xff]   ;;  %v3274_v7 = vld [vmem:[%s2782_s9 + $0xa8] ss:$16 sps:$4 sm:$0xff]  }
 0x56d   : > { %v2012_v1 = vmul.f32 -1.442695, %v1198_v8  ;;  %v1155_v15 = vpop.f32.mrb[19].mxu0  ;;  %v1196_v6 = vpop.f32.mrb[19].mxu1  ;;  %v3278_v8 = vld [vmem:[%s2782_s9 + $0xc4] ss:$16 sps:$4 sm:$0xff]  }
 0x56e   : > { %v2013_v16 = vmul.f32 -1.442695, %v1199_v12  ;;  %v2014_v20 = vmul.f32 -1.442695, %v1201_v18  ;;  %v3286_v10 = vld [vmem:[%s2782_s9 + $0xc0] ss:$16 sps:$4 sm:$0xff]  }
 0x56f   : > { %2256 = vpow2.f32 %v2012_v1  ;;  %v3291_v11 = vld [vmem:[%s2782_s9 + $0xe4] ss:$16 sps:$4 sm:$0xff]   ;;  %v3296_v12 = vld [vmem:[%s2782_s9 + $0xe0] ss:$16 sps:$4 sm:$0xff]   ;;  %v2348_v14 = vld [vmem:[%s2782_s9 + $0xc] ss:$16 sps:$4 sm:$0xff]  }
 0x570   : > { %2258 = vpow2.f32 %v2013_v16  ;;  %v2347_v13 = vld [vmem:[%s2782_s9 + $0x4] ss:$16 sps:$4 sm:$0xff]   ;;  %v2018_v18 = vld [vmem:[%s1824_s16 + $0x58] sm:$0xff] }
 0x571   : > { %2260 = vpow2.f32 %v2014_v20  ;;  %v2017_v1 = vld [vmem:[%s1824_s16 + $0x50] sm:$0xff] }
 0x572   : > { %2262 = vtanh.f32 %v1200_v21  ;;  %v1246_v15 = vunpack.c.h.bf16 %v2017_v1 }
 0x579   : > { %v2257_v22 = vpop.eup %2256 }
 0x57a   : > { %v2259_v23 = vpop.eup %2258  ;;  %v1205_v24 = vadd.f32 1.0, %v2257_v22 }
 0x57b   : > { %v1211_v26 = vadd.f32 1.0, %v2259_v23  ;;  %v2261_v27 = vpop.eup %2260 }
 0x57c   : > { %2264 = vrcp.f32 %v1205_v24  ;;  %v2263_v28 = vpop.eup %2262  ;;  %v1218_v40 = vadd.f32 1.0, %v2261_v27  ;;  %v1248_v27 = vunpack.c.h.bf16 %v2018_v18 }
 0x57d   : > { %2266 = vrcp.f32 %v1211_v26 }
 0x57e   : > { %2268 = vrcp.f32 %v1218_v40 }
 0x586   : > { %v2265_v29 = vpop.eup %2264 }
 0x587   : > { %v2267_v30 = vpop.eup %2266  ;;  %v1222_v25 = vmul.f32 %v2265_v29, %v2263_v28  ;;  %v1247_v29 = vunpack.c.l.bf16 %v2018_v18 }
 0x588   : > { %v1221_v58 = vmul.f32 %v2267_v30, %v3126_v49  ;;  %v2269_v60 = vpop.eup %2268 }
 0x58a   : > { %v1223_v42 = vadd.f32 %v1222_v25, %v1221_v58 }
 0x58c   : > { %2270 = vtanh.f32 %v1223_v42  ;;  %v3178_v59 = vsel %vm1103_vm5, %v1223_v42, %v3126_v49  ;;  %v3226_v49 = vld [vmem:[%s2782_s9 + $0x48] ss:$16 sps:$4 sm:$0xff]  }
 0x596   : > { %v2271_v61 = vpop.eup %2270 }
 0x597   : > { %v1225_v62 = vmul.f32 %v2271_v61, %v2269_v60 }
 0x599   : > { %v3183_v63 = vsel %vm1103_vm5, %v1225_v62, %v3130_v54  ;;  %v1230_v34 = vsel %vm1103_vm5, %v1225_v62, 0.0  ;;  %v3242_v54 = vld [vmem:[%s2782_s9 + $0x68] ss:$16 sps:$4 sm:$0xff]  }
 0x59a   : > { %v1231_v35 = vpack.c.bf16 %v1230_v34, %v1230_v34  ;;  %v1251_v37 = vpack.c.bf16 %v3183_v63, %v3183_v63 }
 0x59c   : > { %1234 = vst [vmem:[%s1233_s29] sm:$0xf] %v1231_v35  ;;  %1285 = vmatmul.mubr.bf16.vlgmr.msra.gmra.mrb[20].mxu0 %v1251_v37  ;;  %1326 = vmatmul.mubr.bf16.vlgmr.msra.gmra.mrb[20].mxu1 %v1251_v37  ;;  %s2032_s29 = smul.u32 4294967184, %s2550_s21 }
 0x59d   : > { %1389 = vmatpush1.bf16.msra.mxu0 %v3188_v41  ;;  %1430 = vmatpush1.bf16.msra.mxu1 %v3192_v43 }
 0x59e   : > { %1390 = vmatprep.subr.bf16.mxu0 %v3196_v44  ;;  %1431 = vmatprep.subr.bf16.mxu1 %v3200_v53  ;;  %s1840_s13 = scalar_lea.vmem %s2774_s17, %s2032_s29 [#allocation4]  ;;  %s1507_s17 = smul.u32 4294967289, %s2550_s21 }
 0x59f   : > { %1420 = vmatprep.mubr.bf16.mxu0 %v2564_v0  ;;  %1461 = vmatprep.mubr.bf16.mxu1 %v2564_v0 }
 0x5a0   : > { %s1508_s16 = sadd.s32 7, %s1507_s17  ;;  %s1680_s17 = sshll.u32 %s2981_s27, 4  ;;  %s3402_s17 = int_to_ptr.vmem [resolvable:$true] %s1680_s17 }
 0x5a1   : > { %1391 = vmatpush1.bf16.msra.mxu0 %v3206_v57  ;;  %1432 = vmatpush1.bf16.msra.mxu1 %v3210_v45 }
 0x5a2   : > { %1392 = vmatprep.subr.bf16.mxu0 %v3214_v46  ;;  %1433 = vmatprep.subr.bf16.mxu1 %v3218_v47 }
 0x5a5   : > { %1393 = vmatpush1.bf16.msra.mxu0 %v3222_v48  ;;  %1434 = vmatpush1.bf16.msra.mxu1 %v3226_v49 }
 0x5a6   : > { %1394 = vmatprep.subr.bf16.mxu0 %v3230_v50  ;;  %1435 = vmatprep.subr.bf16.mxu1 %v3234_v51 }
 0x5a9   : > { %1395 = vmatpush1.bf16.msra.mxu0 %v3238_v52  ;;  %1436 = vmatpush1.bf16.msra.mxu1 %v3242_v54 }
 0x5aa   : > { %1396 = vmatprep.subr.bf16.mxu0 %v3246_v55  ;;  %1437 = vmatprep.subr.bf16.mxu1 %v3250_v56 }
 0x5ad   : > { %1397 = vmatpush1.bf16.msra.mxu0 %v3254_v36  ;;  %1438 = vmatpush1.bf16.msra.mxu1 %v3258_v2 }
 0x5ae   : > { %1398 = vmatprep.subr.bf16.mxu0 %v3262_v3  ;;  %1439 = vmatprep.subr.bf16.mxu1 %v3266_v4 }
 0x5b1   : > { %1399 = vmatpush1.bf16.msra.mxu0 %v3270_v5  ;;  %1440 = vmatpush1.bf16.msra.mxu1 %v3274_v7 }
 0x5b2   : > { %1400 = vmatprep.subr.bf16.mxu0 %v3278_v8  ;;  %1441 = vmatprep.subr.bf16.mxu1 %v3282_v9 }
 0x5b5   : > { %1401 = vmatpush1.bf16.msra.mxu0 %v3286_v10  ;;  %1442 = vmatpush1.bf16.msra.mxu1 %v2909_v31  ;;  %v1245_v31 = vunpack.c.l.bf16 %v2017_v1 }
 0x5b6   : > { %1402 = vmatprep.subr.bf16.mxu0 %v3291_v11  ;;  %1443 = vmatprep.subr.bf16.mxu1 %v2913_v32 }
 0x5b9   : > { %1403 = vmatpush1.bf16.msra.mxu0 %v3296_v12  ;;  %1444 = vmatpush1.bf16.msra.mxu1 %v2918_v33 }
 0x5ba   : > { %1524 = vmatprep.subr.bf16.mxu0 %v2347_v13  ;;  %1565 = vmatprep.subr.bf16.mxu1 %v2348_v14  ;;  %v1238_v13 = vstv %s1236_s12  ;;  %s339_s12 = scalar_lea.vmem [#allocation12], %s1946_s11 }
 0x5bb   : > { %vm1239_vm6 = vcmp.lt.s32.totalorder %v1238_v13, %v2965_v38 }
 0x66f   : > { %v1286_v6 = vpop.f32.mrb[20].mxu0  ;;  %v1327_v16 = vpop.f32.mrb[20].mxu1 }
 0x670   : > { %v1334_v17 = vadd.f32 %v1286_v6, %v1245_v31  ;;  %v1288_v32 = vpop.f32.mrb[21].mxu0  ;;  %v1329_v19 = vpop.f32.mrb[21].mxu1  ;;  %v1336_v25 = vadd.f32 %v1327_v16, %v1247_v29 }
 0x671   : > { %v1335_v20 = vadd.f32 %v1288_v32, %v1246_v15  ;;  %v1290_v21 = vpop.f32.mrb[22].mxu0  ;;  %v1331_v22 = vpop.f32.mrb[22].mxu1  ;;  %v1337_v28 = vadd.f32 %v1329_v19, %v1248_v27 }
 0x672   : > { %v2019_v23 = vmul.f32 -1.442695, %v1334_v17  ;;  %v1291_v33 = vpop.f32.mrb[23].mxu0  ;;  %v1332_v24 = vpop.f32.mrb[23].mxu1 }
 0x673   : > { %v2020_v26 = vmul.f32 -1.442695, %v1335_v20  ;;  %v2021_v30 = vmul.f32 -1.442695, %v1337_v28 }
 0x674   : > { %2272 = vpow2.f32 %v2019_v23 }
 0x675   : > { %2274 = vpow2.f32 %v2020_v26 }
 0x676   : > { %2276 = vpow2.f32 %v2021_v30 }
 0x677   : > { %2278 = vtanh.f32 %v1336_v25 }
 0x67e   : > { %v2273_v40 = vpop.eup %2272 }
 0x67f   : > { %v2275_v39 = vpop.eup %2274  ;;  %v1341_v58 = vadd.f32 1.0, %v2273_v40 }
 0x680   : > { %v1347_v42 = vadd.f32 1.0, %v2275_v39  ;;  %v2277_v60 = vpop.eup %2276 }
 0x681   : > { %2280 = vrcp.f32 %v1341_v58  ;;  %v2279_v61 = vpop.eup %2278  ;;  %v1354_v37 = vadd.f32 1.0, %v2277_v60 }
 0x682   : > { %2282 = vrcp.f32 %v1347_v42  ;;  %v2033_v42 = vld [vmem:[%s1840_s13 + $0x70] sm:$0xff] }
 0x683   : > { %2284 = vrcp.f32 %v1354_v37  ;;  %v1517_v60 = vunpack.c.l.bf16 %v2033_v42  ;;  %v2034_v37 = vld [vmem:[%s1840_s13 + $0x78] sm:$0xff]  ;;  %s2043_s13 = sshll.u32 %s2550_s21, 6 }
 0x68b   : > { %v2281_v62 = vpop.eup %2280 }
 0x68c   : > { %v2283_v34 = vpop.eup %2282  ;;  %v1358_v35 = vmul.f32 %v2281_v62, %v2279_v61  ;;  %v1518_v61 = vunpack.c.h.bf16 %v2033_v42 }
 0x68d   : > { %v1357_v14 = vmul.f32 %v2283_v34, %v3178_v59  ;;  %v2285_v15 = vpop.eup %2284 }
 0x68f   : > { %v1359_v1 = vadd.f32 %v1358_v35, %v1357_v14 }
 0x691   : > { %2286 = vtanh.f32 %v1359_v1  ;;  %v3308_v31 = vsel %vm1239_vm6, %v1359_v1, %v3178_v59  ;;  %v2350_v59 = vld [vmem:[%s2782_s9 + $0xec] ss:$16 sps:$4 sm:$0xff]  }
 0x69b   : > { %v2287_v6 = vpop.eup %2286 }
 0x69c   : > { %v1361_v16 = vmul.f32 %v2287_v6, %v2285_v15 }
 0x69e   : > { %v3313_v17 = vsel %vm1239_vm6, %v1361_v16, %v3183_v63  ;;  %v1366_v18 = vsel %vm1239_vm6, %v1361_v16, 0.0  ;;  %v2351_v63 = vld [vmem:[%s2782_s9 + $0xe8] ss:$16 sps:$4 sm:$0xff]  }
 0x69f   : > { %v1367_v32 = vpack.c.bf16 %v1366_v18, %v1366_v18  ;;  %v1387_v19 = vpack.c.bf16 %v3313_v17, %v3313_v17 }
 0x6a1   : > { %2023 = vst [vmem:[%s1828_s26 + $0x14] sm:$0xf] %v1367_v32  ;;  %1421 = vmatmul.mubr.bf16.vlgmr.msra.gmra.mrb[24].mxu0 %v1387_v19  ;;  %1462 = vmatmul.mubr.bf16.vlgmr.msra.gmra.mrb[24].mxu1 %v1387_v19  ;;  %v1520_v32 = vunpack.c.h.bf16 %v2034_v37  ;;  %s1655_s26 = sand.u32 1, %s2633_s24   ;;  %s1709_s24 = sshll.u32 %s339_s12, 4  ;;  %s3409_s24 = int_to_ptr.vmem [resolvable:$true] %s1709_s24 }
 0x6a2   : > { %1525 = vmatpush1.bf16.msra.mxu0 %v3188_v41  ;;  %1566 = vmatpush1.bf16.msra.mxu1 %v3192_v43  ;;  %v2025_v41 = vld [vmem:[%s1832_s28 + $0x60] sm:$0xff]  ;;  %s3411_s1 = scalar_lea.sflag [#allocation11], %s1655_s26 }
 0x6a3   : > { %1526 = vmatprep.subr.bf16.mxu0 %v3196_v44  ;;  %1567 = vmatprep.subr.bf16.mxu1 %v3200_v53  ;;  %v1381_v43 = vunpack.c.l.bf16 %v2025_v41  ;;  %v1382_v44 = vunpack.c.h.bf16 %v2025_v41 }
 0x6a4   : > { %1556 = vmatprep.mubr.bf16.mxu0 %v2564_v0  ;;  %1597 = vmatprep.mubr.bf16.mxu1 %v2564_v0  ;;  %v2349_v0 = vld [vmem:[%s2782_s9 + $0xc8] ss:$16 sps:$4 sm:$0xff]   ;;  %s1371_s9 = smul.u32 4294967291, %s2550_s21 }
 0x6a6   : > { %1527 = vmatpush1.bf16.msra.mxu0 %v3206_v57  ;;  %1568 = vmatpush1.bf16.msra.mxu1 %v3210_v45  ;;  %s1372_s10 = sadd.s32 6, %s1371_s9 }
 0x6a7   : > { %1528 = vmatprep.subr.bf16.mxu0 %v3214_v46  ;;  %1569 = vmatprep.subr.bf16.mxu1 %v3218_v47  ;;  %v2026_v46 = vld [vmem:[%s1832_s28 + $0x68] sm:$0xff]  ;;  %v1374_v24 = vstv %s1372_s10  ;;  %s3381_s28 = scalar_lea.vmem %s2981_s27, %s2038_s25 [#allocation9]  ;;  %s2566_s27 = smov [#allocation10]  }
 0x6a8   : > { %vm1375_vm7 = vcmp.lt.s32.totalorder %v1374_v24, %v2965_v38 }
 0x6aa   : > { %1529 = vmatpush1.bf16.msra.mxu0 %v3222_v48  ;;  %1570 = vmatpush1.bf16.msra.mxu1 %v3226_v49 }
 0x6ab   : > { %1530 = vmatprep.subr.bf16.mxu0 %v3230_v50  ;;  %1571 = vmatprep.subr.bf16.mxu1 %v3234_v51 }
 0x6ae   : > { %1531 = vmatpush1.bf16.msra.mxu0 %v3238_v52  ;;  %1572 = vmatpush1.bf16.msra.mxu1 %v3242_v54 }
 0x6af   : > { %1532 = vmatprep.subr.bf16.mxu0 %v3246_v55  ;;  %1573 = vmatprep.subr.bf16.mxu1 %v3250_v56 }
 0x6b2   : > { %1533 = vmatpush1.bf16.msra.mxu0 %v3254_v36  ;;  %1574 = vmatpush1.bf16.msra.mxu1 %v3258_v2  ;;  %v1384_v36 = vunpack.c.h.bf16 %v2026_v46 }
 0x6b3   : > { %1534 = vmatprep.subr.bf16.mxu0 %v3262_v3  ;;  %1575 = vmatprep.subr.bf16.mxu1 %v3266_v4  ;;  %v1383_v3 = vunpack.c.l.bf16 %v2026_v46 }
 0x6b6   : > { %1535 = vmatpush1.bf16.msra.mxu0 %v3270_v5  ;;  %1576 = vmatpush1.bf16.msra.mxu1 %v3274_v7 }
 0x6b7   : > { %1536 = vmatprep.subr.bf16.mxu0 %v3278_v8  ;;  %1577 = vmatprep.subr.bf16.mxu1 %v3282_v9 }
 0x6ba   : > { %1537 = vmatpush1.bf16.msra.mxu0 %v3286_v10  ;;  %1578 = vmatpush1.bf16.msra.mxu1 %v2349_v0  ;;  %v1519_v0 = vunpack.c.l.bf16 %v2034_v37 }
 0x6bb   : > { %1538 = vmatprep.subr.bf16.mxu0 %v3291_v11  ;;  %1579 = vmatprep.subr.bf16.mxu1 %v2350_v59 }
 0x6be   : > { %1539 = vmatpush1.bf16.msra.mxu0 %v3296_v12  ;;  %1580 = vmatpush1.bf16.msra.mxu1 %v2351_v63 }
 0x774   : > { %v1422_v53 = vpop.f32.mrb[24].mxu0  ;;  %v1463_v57 = vpop.f32.mrb[24].mxu1 }
 0x775   : > { %v1470_v45 = vadd.f32 %v1422_v53, %v1381_v43  ;;  %v1424_v47 = vpop.f32.mrb[25].mxu0  ;;  %v1465_v48 = vpop.f32.mrb[25].mxu1  ;;  %v1472_v5 = vadd.f32 %v1463_v57, %v1383_v3 }
 0x776   : > { %v1471_v49 = vadd.f32 %v1424_v47, %v1382_v44  ;;  %v1426_v50 = vpop.f32.mrb[26].mxu0  ;;  %v1467_v51 = vpop.f32.mrb[26].mxu1  ;;  %v1473_v2 = vadd.f32 %v1465_v48, %v1384_v36 }
 0x777   : > { %v2027_v52 = vmul.f32 -1.442695, %v1470_v45  ;;  %v1427_v54 = vpop.f32.mrb[27].mxu0  ;;  %v1468_v55 = vpop.f32.mrb[27].mxu1  ;;  %v1510_v51 = vstv %s1508_s16 }
 0x778   : > { %v2028_v56 = vmul.f32 -1.442695, %v1471_v49  ;;  %v2029_v4 = vmul.f32 -1.442695, %v1473_v2  ;;  %vm3370_vm8 = vcmp.lt.s32.totalorder %v1510_v51, %v2965_v38 }
 0x779   : > { %2288 = vpow2.f32 %v2027_v52 }
 0x77a   : > { %2290 = vpow2.f32 %v2028_v56 }
 0x77b   : > { %2292 = vpow2.f32 %v2029_v4 }
 0x77c   : > { %2294 = vtanh.f32 %v1472_v5 }
 0x783   : > { %v2289_v7 = vpop.eup %2288 }
 0x784   : > { %v2291_v8 = vpop.eup %2290  ;;  %v1477_v9 = vadd.f32 1.0, %v2289_v7 }
 0x785   : > { %v1483_v10 = vadd.f32 1.0, %v2291_v8  ;;  %v2293_v11 = vpop.eup %2292 }
 0x786   : > { %2296 = vrcp.f32 %v1477_v9  ;;  %v2295_v12 = vpop.eup %2294  ;;  %v1490_v23 = vadd.f32 1.0, %v2293_v11 }
 0x787   : > { %2298 = vrcp.f32 %v1483_v10 }
 0x788   : > { %2300 = vrcp.f32 %v1490_v23 }
 0x790   : > { %v2297_v20 = vpop.eup %2296 }
 0x791   : > { %v2299_v21 = vpop.eup %2298  ;;  %v1494_v22 = vmul.f32 %v2297_v20, %v2295_v12 }
 0x792   : > { %v1493_v33 = vmul.f32 %v2299_v21, %v3308_v31  ;;  %v2301_v28 = vpop.eup %2300 }
 0x794   : > { %v1495_v26 = vadd.f32 %v1494_v22, %v1493_v33 }
 0x796   : > { %2302 = vtanh.f32 %v1495_v26  ;;  %v3355_v27 = vsel %vm1375_vm7, %v1495_v26, %v3308_v31 }
 0x7a0   : > { %v2303_v29 = vpop.eup %2302 }
 0x7a1   : > { %v1497_v30 = vmul.f32 %v2303_v29, %v2301_v28 }
 0x7a3   : > { %v3360_v25 = vsel %vm1375_vm7, %v1497_v30, %v3313_v17  ;;  %v1502_v40 = vsel %vm1375_vm7, %v1497_v30, 0.0 }
 0x7a4   : > { %v1503_v39 = vpack.c.bf16 %v1502_v40, %v1502_v40  ;;  %v1523_v58 = vpack.c.bf16 %v3360_v25, %v3360_v25 }
 0x7a6   : > { %2031 = vst [vmem:[%s1836_s0 + $0x18] sm:$0xf] %v1503_v39  ;;  %1557 = vmatmul.mubr.bf16.vlgmr.msra.gmra.mrb[28].mxu0 %v1523_v58  ;;  %1598 = vmatmul.mubr.bf16.vlgmr.msra.gmra.mrb[28].mxu1 %v1523_v58  ;;  %s332_s0 = scalar_lea.vmem [#allocation10], %s1946_s11  ;;  %s3400_s11 = scalar_lea.hbm %s3510_s3, %s2043_s13 }
 0x7a7   : > { %s1696_s29 = sshll.u32 %s332_s0, 4  ;;  %s3395_s29 = int_to_ptr.vmem [resolvable:$true] %s1696_s29 }
 0x7a8   : > { %s2412_s21 = scalar_lea.vmem %s3395_s29, 128 }
 0x7a9   : > { %p2413_p0 = scmp.ne.s32.totalorder %s3395_s29, %s2412_s21 }
 0x7ab   : > { %p2414_p12 = pnand %p2413_p0, %p3536_p3 }
 0x7ad   : > { %p2415_p13 = pneg %p2414_p12 }
 0x879   : > { %v1558_v62 = vpop.f32.mrb[28].mxu0  ;;  %v1599_v34 = vpop.f32.mrb[28].mxu1 }
 0x87a   : > { %v1606_v35 = vadd.f32 %v1558_v62, %v1517_v60  ;;  %v1560_v13 = vpop.f32.mrb[29].mxu0  ;;  %v1601_v14 = vpop.f32.mrb[29].mxu1  ;;  %v1608_v63 = vadd.f32 %v1599_v34, %v1519_v0 }
 0x87b   : > { %v1607_v1 = vadd.f32 %v1560_v13, %v1518_v61  ;;  %v1562_v31 = vpop.f32.mrb[30].mxu0  ;;  %v1603_v15 = vpop.f32.mrb[30].mxu1  ;;  %v1609_v19 = vadd.f32 %v1601_v14, %v1520_v32 }
 0x87c   : > { %v2035_v6 = vmul.f32 -1.442695, %v1606_v35  ;;  %v1563_v16 = vpop.f32.mrb[31].mxu0  ;;  %v1604_v17 = vpop.f32.mrb[31].mxu1 }
 0x87d   : > { %v2036_v18 = vmul.f32 -1.442695, %v1607_v1  ;;  %v2037_v59 = vmul.f32 -1.442695, %v1609_v19 }
 0x87e   : > { %2304 = vpow2.f32 %v2035_v6 }
 0x87f   : > { %2306 = vpow2.f32 %v2036_v18 }
 0x880   : > { %2308 = vpow2.f32 %v2037_v59 }
 0x881   : > { %2310 = vtanh.f32 %v1608_v63 }
 0x888   : > { %v2305_v41 = vpop.eup %2304 }
 0x889   : > { %v2307_v43 = vpop.eup %2306  ;;  %v1613_v44 = vadd.f32 1.0, %v2305_v41 }
 0x88a   : > { %v1619_v53 = vadd.f32 1.0, %v2307_v43  ;;  %v2309_v57 = vpop.eup %2308 }
 0x88b   : > { %2312 = vrcp.f32 %v1613_v44  ;;  %v2311_v45 = vpop.eup %2310  ;;  %v1626_v49 = vadd.f32 1.0, %v2309_v57 }
 0x88c   : > { %2314 = vrcp.f32 %v1619_v53 }
 0x88d   : > { %2316 = vrcp.f32 %v1626_v49 }
 0x895   : > { %v2313_v46 = vpop.eup %2312 }
 0x896   : > { %v2315_v47 = vpop.eup %2314  ;;  %v1630_v48 = vmul.f32 %v2313_v46, %v2311_v45 }
 0x897   : > { %v1629_v50 = vmul.f32 %v2315_v47, %v3355_v27  ;;  %v2317_v38 = vpop.eup %2316 }
 0x899   : > { %v1631_v52 = vadd.f32 %v1630_v48, %v1629_v50 }
 0x89b   : > { %2318 = vtanh.f32 %v1631_v52  ;;  %v1634_v55 = vsel %vm3370_vm8, %v1631_v52, %v3355_v27 }
 0x89c   : > { %1649 = vst [vmem:[%s339_s12] sm:$0xff] %v1634_v55  ;;  %s2416_s12 = sshll.u32 %s2566_s27, 4  ;;  %s2417_s12 = int_to_ptr.vmem [resolvable:$false] %s2416_s12 }
 0x89d   : > { %s2418_s30 = scalar_lea.vmem %s2417_s12, 256  ;;  %p2419_p7 = scmp.lt.s32.totalorder %s3395_s29, %s2417_s12 }
 0x89e   : > { %p2420_p10 = scmp.lt.s32.totalorder %s2418_s30, %s2412_s21 }
 0x8a0   : > { %p2421_p9 = por %p2420_p10, %p2419_p7 }
 0x8a2   : > { %p2422_p11 = pnand %p2421_p9, %p2415_p13 }
 0x8a5   : > { %v2319_v56 = vpop.eup %2318 }
 0x8a6   : > { %v1633_v36 = vmul.f32 %v2319_v56, %v2317_v38 }
 0x8a8   : > { %v1635_v2 = vsel %vm3370_vm8, %v1633_v36, %v3360_v25  ;;  %v1638_v3 = vsel %vm3370_vm8, %v1633_v36, 0.0 }
 0x8a9   : > { %v1639_v4 = vpack.c.bf16 %v1638_v3, %v1638_v3  ;;  %1647 = vst [vmem:[%s332_s0] sm:$0xff] %v1635_v2 }
 0x8aa   : > { %2425 = shalt.err (!%p2422_p11)
}
 0x8ab   : > { %s2426_s26 = scalar_lea.hbm %s3386_s14, 128  ;;  %s2430_s13 = scalar_lea.hbm %s3511_s4, 256 }
 0x8ac   : > { %p2427_p1 = scmp.ne.s32.totalorder %s3386_s14, %s2426_s26  ;;  %p2431_p5 = scmp.lt.u32.totalorder %s3386_s14, %s3511_s4 }
 0x8ad   : > { %p2432_p4 = scmp.lt.u32.totalorder %s2430_s13, %s2426_s26  ;;  %p2434_p0 = scmp.lt.u32.totalorder %s2426_s26, %s3386_s14 }
 0x8ae   : > { %p2428_p6 = pnand %p2427_p1, %p3536_p3 }
 0x8af   : > { %p2433_p8 = por %p2432_p4, %p2431_p5 }
 0x8b0   : > { %p2429_p2 = pneg %p2428_p6 }
 0x8b1   : > { %p2435_p12 = por %p2434_p0, %p2433_p8 }
 0x8b3   : > { %p2436_p13 = pnand %p2435_p12, %p2429_p2 }
 0x8b5   : > { %2439 = shalt.err (!%p2436_p13)
}
 0x8b6   : > { %2064 = dma.vmem_to_hbm [thread:$0]  (%p3536_p3), %s3395_s29, 128, %s3386_s14, %s3411_s1   ;;  %2039 = vst [vmem:[%s3381_s28 + $0x1c] sm:$0xf] %v1639_v4 }
 0x8b7   : > { %s2440_s9 = scalar_lea.vmem %s3409_s24, 128  ;;  %s2567_s21 = smov [#allocation12]  }
 0x8b8   : > { %p2441_p7 = scmp.ne.s32.totalorder %s3409_s24, %s2440_s9  ;;  %s2444_s27 = sshll.u32 %s2567_s21, 4  ;;  %s2445_s27 = int_to_ptr.vmem [resolvable:$false] %s2444_s27 }
 0x8b9   : > { %s2446_s12 = scalar_lea.vmem %s2445_s27, 256  ;;  %p2447_p11 = scmp.lt.s32.totalorder %s3409_s24, %s2445_s27 }
 0x8ba   : > { %p2442_p10 = pnand %p2441_p7, %p3536_p3  ;;  %p2448_p1 = scmp.lt.s32.totalorder %s2446_s12, %s2440_s9 }
 0x8bc   : > { %p2443_p9 = pneg %p2442_p10  ;;  %p2449_p6 = por %p2448_p1, %p2447_p11 }
 0x8be   : > { %p2450_p2 = pnand %p2449_p6, %p2443_p9 }
 0x8c0   : > { %2453 = shalt.err (!%p2450_p2)
}
 0x8c1   : > { %s2454_s28 = scalar_lea.hbm %s3393_s2, 128  ;;  %s2458_s30 = scalar_lea.hbm %s3512_s5, 256 }
 0x8c2   : > { %p2455_p5 = scmp.ne.s32.totalorder %s3393_s2, %s2454_s28  ;;  %p2459_p0 = scmp.lt.u32.totalorder %s3393_s2, %s3512_s5 }
 0x8c3   : > { %p2460_p12 = scmp.lt.u32.totalorder %s2458_s30, %s2454_s28  ;;  %p2462_p7 = scmp.lt.u32.totalorder %s2454_s28, %s3393_s2 }
 0x8c4   : > { %p2456_p4 = pnand %p2455_p5, %p3536_p3 }
 0x8c5   : > { %p2461_p13 = por %p2460_p12, %p2459_p0 }
 0x8c6   : > { %p2457_p8 = pneg %p2456_p4 }
 0x8c7   : > { %p2463_p10 = por %p2462_p7, %p2461_p13 }
 0x8c9   : > { %p2464_p9 = pnand %p2463_p10, %p2457_p8 }
 0x8cb   : > { %2467 = shalt.err (!%p2464_p9)
}
 0x8cc   : > { %2065 = dma.vmem_to_hbm [thread:$0]  (%p3536_p3), %s3409_s24, 128, %s3393_s2, %s3411_s1  }
 0x8cd   : > { %s1651_s0 = scalar_lea.sflag [#allocation6], %s2770_s15  ;;  %s2468_s13 = scalar_lea.vmem %s3402_s17, 512 }
 0x8ce   : > { %p2469_p11 = scmp.ne.s32.totalorder %s3402_s17, %s2468_s13  ;;  %s2568_s16 = smov [#allocation9]  }
 0x8cf   : > { %s2472_s25 = sshll.u32 %s2568_s16, 4  ;;  %s2473_s25 = int_to_ptr.vmem [resolvable:$false] %s2472_s25 }
 0x8d0   : > { %p2470_p1 = pnand %p2469_p11, %p3536_p3  ;;  %s2474_s9 = scalar_lea.vmem %s2473_s25, 1024 }
 0x8d1   : > { %p2475_p2 = scmp.lt.s32.totalorder %s3402_s17, %s2473_s25  ;;  %p2476_p5 = scmp.lt.s32.totalorder %s2474_s9, %s2468_s13 }
 0x8d2   : > { %p2471_p6 = pneg %p2470_p1 }
 0x8d3   : > { %p2477_p4 = por %p2476_p5, %p2475_p2 }
 0x8d5   : > { %p2478_p8 = pnand %p2477_p4, %p2471_p6 }
 0x8d7   : > { %2481 = shalt.err (!%p2478_p8)
}
 0x8d8   : > { %s2482_s2 = scalar_lea.hbm %s3400_s11, 512  ;;  %s2486_s21 = scalar_lea.hbm %s3510_s3, 1024 }
 0x8d9   : > { %p2483_p0 = scmp.ne.s32.totalorder %s3400_s11, %s2482_s2  ;;  %p2487_p7 = scmp.lt.u32.totalorder %s3400_s11, %s3510_s3 }
 0x8da   : > { %p2488_p10 = scmp.lt.u32.totalorder %s2486_s21, %s2482_s2  ;;  %p2490_p11 = scmp.lt.u32.totalorder %s2482_s2, %s3400_s11 }
 0x8db   : > { %p2484_p12 = pnand %p2483_p0, %p3536_p3 }
 0x8dc   : > { %p2489_p9 = por %p2488_p10, %p2487_p7 }
 0x8dd   : > { %p2485_p13 = pneg %p2484_p12 }
 0x8de   : > { %p2491_p1 = por %p2490_p11, %p2489_p9 }
 0x8e0   : > { %p2492_p6 = pnand %p2491_p1, %p2485_p13 }
 0x8e2   : > { %2495 = shalt.err (!%p2492_p6)
}
 0x8e3   : > { %s2569_s28 = smov 64   ;;  %s2570_s14 = smov 128  }
 0x8e4   : > { %s2571_s29 = smov 4  }
 0x8e5   : > { %2063 = dma.vmem_to_hbm [thread:$0]  (%p3536_p3), %s3402_s17, 512, %s3400_s11, %s1651_s0, %s2569_s28, %s2570_s14, %s2571_s29  }
 0x8e6 PF: > { %s1721_s30 = sand.u32 1, %s2538_s18   ;;  %p3537_p2 = scmp.ne.s32.totalorder %s3525_s8, 0 }
 0x8e7   : > { %p3538_p5 = scmp.ge.s32.totalorder %s2558_s23, 2  ;;  %s1722_s26 = scalar_lea.sflag [#allocation6], %s1721_s30 }
 0x8e9   : > { %p2077_p4 = pnand %p3538_p5, %p3537_p2 }
 0x8eb   : > { %2529 = dma.done.wait (!%p2077_p4), %s1722_s26, 512  }
 0x8ec   : > { %2531 = vsyncadd (!%p2077_p4), %s1722_s26, 4294966784  ;;  %s3539_s10 = sadd.s32 4294967294, %s2558_s23  }
 0x8ed   : > { %s1730_s13 = sand.u32 1, %s3539_s10  }
 0x8ee   : > { %s1731_s16 = scalar_lea.sflag [#allocation11], %s1730_s13 }
 0x8ef   : > { %2533 = dma.done.wait (!%p2077_p4), %s1731_s16, 256  }
 0x8f0   : > { %2535 = vsyncadd (!%p2077_p4), %s1731_s16, 4294967040  ;;  %s28_s23 = sadd.s32 1, %s2558_s23   ;;  %s3540_s6 = sld [smem:[#allocation17_spill]] }
 0x8f1   : > { %p25_p3 = scmp.ge.s32.totalorder %s28_s23, 4   ;;  %s3541_s18 = smov %s2542_s19 }
 0x8f2   : > { %s3542_s19 = smov %s2546_s20  ;;  %s3543_s20 = smov %s2664_s7 }
 0x8f3   : > { %s3544_s21 = smov %s2554_s22  ;;  %27 = sbr.rel (!%p25_p3) target bundleno = 14 (0xe), region = 146 }
 0x8f6   : > { %s3545_s22 = smov %s3540_s6 }
 0x8fa   :  { %1745 = vsyncpa [#allocation5], 1 }
 0x8fb   :  { %1747 = vsyncpa [#allocation5 + $0x1], 1 }
 0x8fc   :  { %1748 = vsyncpa [#allocation8], 1 }
 0x8fd   :  { %1750 = vsyncpa [#allocation8 + $0x1], 1 }
 0x8fe   :  { %1751 = vsyncpa [#allocation6], 1 }
 0x8ff   :  { %1753 = vsyncpa [#allocation6 + $0x1], 1 }
 0x900   :  { %1754 = vsyncpa [#allocation11], 1 }
 0x901   :  { %1756 = vsyncpa [#allocation11 + $0x1], 1 }

</bundles_post_ra>
